<compile_context>
chip_gen: v6e
topology: v6e:2x2x1
jax: 0.10.0
libtpu: 0.0.40
codegen_flags: <defaults>
</compile_context>

<pallas_src>
import functools
import math

import jax
import jax.numpy as jnp
from jax.experimental import pallas as pl
from jax.experimental.pallas import tpu as pltpu


# --------------------------------------------------------------------------
# tiling helper
# --------------------------------------------------------------------------

def _pick_tile(dim, want, align):
    """Largest multiple of `align` that divides `dim` and is <= `want`.

    Falls back to the full dimension (always a legal block size) when no
    aligned divisor exists — e.g. the tiny demo shapes in __main__.
    """
    if dim <= want:
        return dim
    t = (want // align) * align
    while t >= align:
        if dim % t == 0:
            return t
        t -= align
    return dim


# --------------------------------------------------------------------------
# Pallas kernels
# --------------------------------------------------------------------------

def linear_pallas(x, w, b, *, out_dtype=None, tile_m=512, tile_n=256):
    """y = x @ w + b on the MXU, tiled over (M, N); K kept whole (small here).

    Both grid axes are 'parallel' (v7x megacore sharding).  Activations are
    cast to the weight dtype (bf16) in-kernel; accumulation is f32.
    """
    M, K = x.shape
    K2, N = w.shape
    assert K == K2
    out_dtype = out_dtype or x.dtype
    tm = _pick_tile(M, tile_m, 8)
    tn = _pick_tile(N, tile_n, 128)

    def kernel(x_ref, w_ref, b_ref, o_ref):
        xv = x_ref[...].astype(w_ref.dtype)
        acc = jnp.dot(xv, w_ref[...], preferred_element_type=jnp.float32)
        o_ref[...] = (acc + b_ref[...].astype(jnp.float32)).astype(o_ref.dtype)

    bytes_accessed = (x.size * x.dtype.itemsize + w.size * w.dtype.itemsize
                      + b.size * b.dtype.itemsize
                      + M * N * jnp.dtype(out_dtype).itemsize)
    return pl.pallas_call(
        kernel,
        out_shape=jax.ShapeDtypeStruct((M, N), out_dtype),
        grid=(M // tm, N // tn),
        in_specs=[
            pl.BlockSpec((tm, K), lambda i, j: (i, 0)),
            pl.BlockSpec((K, tn), lambda i, j: (0, j)),
            pl.BlockSpec((1, tn), lambda i, j: (0, j)),   # bias tracks N tile
        ],
        out_specs=pl.BlockSpec((tm, tn), lambda i, j: (i, j)),
        compiler_params=pltpu.CompilerParams(
            dimension_semantics=("parallel", "parallel")),
        cost_estimate=pl.CostEstimate(
            flops=2 * M * K * N, transcendentals=0,
            bytes_accessed=bytes_accessed),
    )(x, w, b)


def cost_volume_pallas(f1, f2, *, tile_q=256, tile_k=256):
    """Correlation volume (B,S,C) x (B,S,C) -> (B,S,S) / sqrt(C), bf16 out.

    Tiled over (batch, S_q, S_k); contraction over the last dim of *both*
    operands via dot_general so no in-kernel transpose (no XLU passes).
    """
    B, S, C = f1.shape
    scale = 1.0 / math.sqrt(C)
    tq = _pick_tile(S, tile_q, 8)
    tk = _pick_tile(S, tile_k, 128)

    def kernel(f1_ref, f2_ref, o_ref):
        corr = jax.lax.dot_general(
            f1_ref[0], f2_ref[0], (((1,), (1,)), ((), ())),
            preferred_element_type=jnp.float32)
        o_ref[0] = (corr * scale).astype(o_ref.dtype)

    return pl.pallas_call(
        kernel,
        out_shape=jax.ShapeDtypeStruct((B, S, S), jnp.bfloat16),
        grid=(B, S // tq, S // tk),
        in_specs=[
            pl.BlockSpec((1, tq, C), lambda b, i, j: (b, i, 0)),
            pl.BlockSpec((1, tk, C), lambda b, i, j: (b, j, 0)),
        ],
        out_specs=pl.BlockSpec((1, tq, tk), lambda b, i, j: (b, i, j)),
        compiler_params=pltpu.CompilerParams(
            dimension_semantics=("parallel", "parallel", "parallel")),
        cost_estimate=pl.CostEstimate(
            flops=2 * B * S * S * C, transcendentals=0,
            bytes_accessed=(f1.size + f2.size) * f1.dtype.itemsize + B * S * S * 2),
    )(f1, f2)


def latent_proj_pallas(cost2d, ctx2d, w_cost, w_ctx, b, *, tile_m=512, tile_n=256):
    """cost_memory = cost2d @ W_cost + ctx2d @ W_ctx + b  (concat-free split).

    Replaces jnp.concatenate([cost, context]) @ W: no extra HBM pass for the
    concatenated operand and no awkward non-128-multiple K.
    """
    M, Kc = cost2d.shape
    M2, Kx = ctx2d.shape
    assert M == M2
    N = w_cost.shape[1]
    tm = _pick_tile(M, tile_m, 8)
    tn = _pick_tile(N, tile_n, 128)

    def kernel(c_ref, x_ref, wc_ref, wx_ref, b_ref, o_ref):
        acc = jnp.dot(c_ref[...].astype(wc_ref.dtype), wc_ref[...],
                      preferred_element_type=jnp.float32)
        acc = acc + jnp.dot(x_ref[...].astype(wx_ref.dtype), wx_ref[...],
                            preferred_element_type=jnp.float32)
        o_ref[...] = (acc + b_ref[...].astype(jnp.float32)).astype(o_ref.dtype)

    bytes_accessed = (cost2d.size * cost2d.dtype.itemsize
                      + ctx2d.size * ctx2d.dtype.itemsize
                      + (w_cost.size + w_ctx.size) * w_cost.dtype.itemsize
                      + b.size * b.dtype.itemsize + M * N * 2)
    return pl.pallas_call(
        kernel,
        out_shape=jax.ShapeDtypeStruct((M, N), jnp.bfloat16),
        grid=(M // tm, N // tn),
        in_specs=[
            pl.BlockSpec((tm, Kc), lambda i, j: (i, 0)),
            pl.BlockSpec((tm, Kx), lambda i, j: (i, 0)),
            pl.BlockSpec((Kc, tn), lambda i, j: (0, j)),
            pl.BlockSpec((Kx, tn), lambda i, j: (0, j)),
            pl.BlockSpec((1, tn), lambda i, j: (0, j)),
        ],
        out_specs=pl.BlockSpec((tm, tn), lambda i, j: (i, j)),
        compiler_params=pltpu.CompilerParams(
            dimension_semantics=("parallel", "parallel")),
        cost_estimate=pl.CostEstimate(
            flops=2 * M * N * (Kc + Kx), transcendentals=0,
            bytes_accessed=bytes_accessed),
    )(cost2d, ctx2d, w_cost, w_ctx, b)


def mean_cls_pallas(cm, w, b, *, tile_s=128):
    """mean over s of (B, S, K*D) followed by cls_head Linear(K*D, 2).

    cost_memory stays b-major (no wrapper transpose / extra HBM pass).  Each
    grid step reduces a whole (B, TS, KD) block into an f32 VMEM accumulator
    ('arbitrary' reduction axis); the last step applies the cls linear.
    """
    B, S, KD = cm.shape
    N = w.shape[1]
    ts = _pick_tile(S, tile_s, 8)
    inv_s = 1.0 / float(S)

    def kernel(cm_ref, w_ref, b_ref, o_ref, acc_ref):
        s = pl.program_id(0)

        @pl.when(s == 0)
        def _():
            acc_ref[...] = jnp.zeros_like(acc_ref)

        acc_ref[...] += jnp.sum(cm_ref[...].astype(jnp.float32), axis=1)

        @pl.when(s == pl.num_programs(0) - 1)
        def _():
            mean = acc_ref[...] * inv_s
            out = jnp.dot(mean, w_ref[...].astype(jnp.float32),
                          preferred_element_type=jnp.float32)
            o_ref[...] = (out + b_ref[...]).astype(o_ref.dtype)

    return pl.pallas_call(
        kernel,
        out_shape=jax.ShapeDtypeStruct((B, N), jnp.float32),
        grid=(S // ts,),
        in_specs=[
            pl.BlockSpec((B, ts, KD), lambda s: (0, s, 0)),
            pl.BlockSpec((KD, N), lambda s: (0, 0)),
            pl.BlockSpec((1, N), lambda s: (0, 0)),
        ],
        out_specs=pl.BlockSpec((B, N), lambda s: (0, 0)),
        scratch_shapes=[pltpu.VMEM((B, KD), jnp.float32)],
        compiler_params=pltpu.CompilerParams(dimension_semantics=("arbitrary",)),
    )(cm, w, b)


# --------------------------------------------------------------------------
# Model glue (plain JAX reshapes around the Pallas kernels)
# --------------------------------------------------------------------------

def patch_embed(img_nchw, w, b, patch, out_dtype=jnp.bfloat16):
    """Stride-`patch` conv implemented as im2col + tiled Pallas matmul."""
    B, Cin, H, W = img_nchw.shape
    h, ww = H // patch, W // patch
    x = jnp.transpose(img_nchw, (0, 2, 3, 1))                # NHWC
    x = x.reshape(B, h, patch, ww, patch, Cin)
    x = jnp.transpose(x, (0, 1, 3, 2, 4, 5))                 # (B,h,w,P,P,Cin)
    x = x.reshape(B * h * ww, patch * patch * Cin)
    y = linear_pallas(x, w, b, out_dtype=out_dtype)          # (B*h*w, Cout)
    return y.reshape(B, h * ww, w.shape[1]), (h, ww)


def flowformer_forward(cfg, params, image1, image2):
    B = image1.shape[0]
    patch = cfg["patch_size"]
    K, D = cfg["cost_latent_token_num"], cfg["cost_latent_dim"]

    # ---- context encoder (twins_svt_large stand-in) ----
    if cfg["context_concat"]:
        ctx_in = jnp.concatenate([image1, image2], axis=1)
    else:
        ctx_in = image1
    context, (h, w) = patch_embed(ctx_in, params["ctx_w"], params["ctx_b"], patch)
    S = h * w                                                # context.shape[-2:] -> h*w

    # ---- memory encoder (feature embed + cost volume + latent projection) ----
    f1, _ = patch_embed(image1, params["feat_w"], params["feat_b"], patch)
    f2, _ = patch_embed(image2, params["feat_w"], params["feat_b"], patch)
    cost = cost_volume_pallas(f1, f2)                        # (B, S, S) bf16

    cost2d = cost.reshape(B * S, S)
    ctx2d = context.reshape(B * S, -1)
    cm = latent_proj_pallas(cost2d, ctx2d,
                            params["lat_w_cost"], params["lat_w_ctx"],
                            params["lat_b"])                 # (B*S, K*D) bf16
    cost_memory = cm.reshape(B, S, K * D)                    # '(b s) n c -> b s (n c)'

    # ---- mean over s + flatten + cls_head Linear(1024, 2), fused in one kernel ----
    pred = mean_cls_pallas(cost_memory, params["cls_w"], params["cls_b"])
    return pred                                              # (B, 2)


def init_params(key, cfg, in_ch=3, ctx_dim=256, feat_dim=256, S=16):
    patch = cfg["patch_size"]
    K, D = cfg["cost_latent_token_num"], cfg["cost_latent_dim"]
    ctx_in_ch = in_ch * (2 if cfg["context_concat"] else 1)
    ks = jax.random.split(key, 5)
    f32, bf16 = jnp.float32, jnp.bfloat16
    return {
        # matmul weights stored bf16 (MXU-native); biases / cls head in f32
        "ctx_w": (jax.random.normal(ks[0], (patch * patch * ctx_in_ch, ctx_dim), f32) * 0.02).astype(bf16),
        "ctx_b": jnp.zeros((1, ctx_dim), f32),
        "feat_w": (jax.random.normal(ks[1], (patch * patch * in_ch, feat_dim), f32) * 0.02).astype(bf16),
        "feat_b": jnp.zeros((1, feat_dim), f32),
        "lat_w_cost": (jax.random.normal(ks[2], (S, K * D), f32) * 0.02).astype(bf16),
        "lat_w_ctx": (jax.random.normal(ks[3], (ctx_dim, K * D), f32) * 0.02).astype(bf16),
        "lat_b": jnp.zeros((1, K * D), f32),
        "cls_w": jax.random.normal(ks[4], (K * D, 2), f32) * 0.02,   # nn.Linear(1024, 2)
        "cls_b": jnp.zeros((1, 2), f32),
    }


if __name__ == "__main__":
    cfg = {
        "cnet": "twins",
        "pretrain": False,
        "context_concat": False,
        "patch_size": 8,
        "cost_latent_token_num": 8,    # n
        "cost_latent_dim": 128,        # c  -> n*c = 1024 matches cls_head
    }

    key = jax.random.PRNGKey(0)
    k1, k2, kp = jax.random.split(key, 3)
    # Small shapes: B=2, 3 channels, 32x32 images -> h=w=4, S=16 tokens.
    image1 = jax.random.normal(k1, (2, 3, 32, 32), jnp.float32)
    image2 = jax.random.normal(k2, (2, 3, 32, 32), jnp.float32)

    S = (32 // cfg["patch_size"]) ** 2
    params = init_params(kp, cfg, in_ch=3, S=S)

    fwd = jax.jit(functools.partial(flowformer_forward, cfg))
    pred = fwd(params, image1, image2)
    jax.block_until_ready(pred)

    assert pred.shape == (2, 2), pred.shape
    assert pred.dtype == jnp.float32
    assert bool(jnp.all(jnp.isfinite(pred)))
    print("KERNEL_OK")
</pallas_src>

<mosaic_0001>
module attributes {stable_mosaic.version = 11 : i64} {
  func.func @kernel(%arg0: i32, %arg1: i32, %arg2: memref<32x192xf32, #tpu.memory_space<vmem>>, %arg3: memref<192x256xbf16, #tpu.memory_space<vmem>>, %arg4: memref<1x256xf32, #tpu.memory_space<vmem>>, %arg5: memref<32x256xbf16, #tpu.memory_space<vmem>>) attributes {dimension_semantics = [#tpu.dimension_semantics<parallel>, #tpu.dimension_semantics<parallel>], iteration_bounds = array<i64: 1, 1>, scalar_prefetch = 0 : i64, scratch_operands = 0 : i64, tpu.core_type = #tpu.core_type<tc>, window_params = [{transform_indices = @transform_0, window_bounds = array<i64: 32, 192>}, {transform_indices = @transform_1, window_bounds = array<i64: 192, 256>}, {transform_indices = @transform_2, window_bounds = array<i64: 1, 256>}, {transform_indices = @transform_3, window_bounds = array<i64: 32, 256>}]} {
    %c0 = arith.constant 0 : index
    %c0_0 = arith.constant 0 : index
    %0 = vector.load %arg2[%c0, %c0_0] : memref<32x192xf32, #tpu.memory_space<vmem>>, vector<32x192xf32>
    %1 = arith.truncf %0 : vector<32x192xf32> to vector<32x192xbf16>
    %c0_1 = arith.constant 0 : index
    %c0_2 = arith.constant 0 : index
    %2 = vector.load %arg3[%c0_1, %c0_2] : memref<192x256xbf16, #tpu.memory_space<vmem>>, vector<192x256xbf16>
    %cst = arith.constant dense<0.000000e+00> : vector<32x256xf32>
    %3 = tpu.matmul %1, %2, %cst {dimension_numbers = #tpu.dot_dimension_numbers<[1], [0], [0], [1], [0, 0, 1, 1], [], []>} : vector<32x192xbf16>, vector<192x256xbf16>, vector<32x256xf32> -> vector<32x256xf32>
    %c0_3 = arith.constant 0 : index
    %c0_4 = arith.constant 0 : index
    %4 = vector.load %arg4[%c0_3, %c0_4] : memref<1x256xf32, #tpu.memory_space<vmem>>, vector<1x256xf32>
    %5 = vector.broadcast %4 : vector<1x256xf32> to vector<32x256xf32>
    %6 = arith.addf %3, %5 : vector<32x256xf32>
    %7 = arith.truncf %6 : vector<32x256xf32> to vector<32x256xbf16>
    %c0_5 = arith.constant 0 : index
    %c0_6 = arith.constant 0 : index
    %8 = vector.load %arg5[%c0_5, %c0_6] : memref<32x256xbf16, #tpu.memory_space<vmem>>, vector<32x256xbf16>
    tpu.vector_store %arg5[%c0_5, %c0_6], %7 {strides = array<i32>} : memref<32x256xbf16, #tpu.memory_space<vmem>>, vector<32x256xbf16>,
    return
  }
  func.func @transform_0(%arg0: i32, %arg1: i32) -> (i32, i32) {
    %c0_i32 = arith.constant 0 : i32
    %c0_i32_0 = arith.constant 0 : i32
    return %arg0, %c0_i32 : i32, i32
  }
  func.func @transform_1(%arg0: i32, %arg1: i32) -> (i32, i32) {
    %c0_i32 = arith.constant 0 : i32
    %c0_i32_0 = arith.constant 0 : i32
    return %c0_i32, %arg1 : i32, i32
  }
  func.func @transform_2(%arg0: i32, %arg1: i32) -> (i32, i32) {
    %c0_i32 = arith.constant 0 : i32
    %c0_i32_0 = arith.constant 0 : i32
    return %c0_i32, %arg1 : i32, i32
  }
  func.func @transform_3(%arg0: i32, %arg1: i32) -> (i32, i32) {
    %c0_i32 = arith.constant 0 : i32
    return %arg0, %arg1 : i32, i32
  }
}

module attributes {stable_mosaic.version = 11 : i64} {
  func.func @kernel(%arg0: i32, %arg1: i32, %arg2: memref<32x16xbf16, #tpu.memory_space<vmem>>, %arg3: memref<32x256xbf16, #tpu.memory_space<vmem>>, %arg4: memref<16x256xbf16, #tpu.memory_space<vmem>>, %arg5: memref<256x256xbf16, #tpu.memory_space<vmem>>, %arg6: memref<1x256xf32, #tpu.memory_space<vmem>>, %arg7: memref<32x256xbf16, #tpu.memory_space<vmem>>) attributes {dimension_semantics = [#tpu.dimension_semantics<parallel>, #tpu.dimension_semantics<parallel>], iteration_bounds = array<i64: 1, 4>, scalar_prefetch = 0 : i64, scratch_operands = 0 : i64, tpu.core_type = #tpu.core_type<tc>, window_params = [{transform_indices = @transform_0, window_bounds = array<i64: 32, 16>}, {transform_indices = @transform_1, window_bounds = array<i64: 32, 256>}, {transform_indices = @transform_2, window_bounds = array<i64: 16, 256>}, {transform_indices = @transform_3, window_bounds = array<i64: 256, 256>}, {transform_indices = @transform_4, window_bounds = array<i64: 1, 256>}, {transform_indices = @transform_5, window_bounds = array<i64: 32, 256>}]} {
    %c0 = arith.constant 0 : index
    %c0_0 = arith.constant 0 : index
    %0 = vector.load %arg2[%c0, %c0_0] : memref<32x16xbf16, #tpu.memory_space<vmem>>, vector<32x16xbf16>
    %c0_1 = arith.constant 0 : index
    %c0_2 = arith.constant 0 : index
    %1 = vector.load %arg4[%c0_1, %c0_2] : memref<16x256xbf16, #tpu.memory_space<vmem>>, vector<16x256xbf16>
    %cst = arith.constant dense<0.000000e+00> : vector<32x256xf32>
    %2 = tpu.matmul %0, %1, %cst {dimension_numbers = #tpu.dot_dimension_numbers<[1], [0], [0], [1], [0, 0, 1, 1], [], []>} : vector<32x16xbf16>, vector<16x256xbf16>, vector<32x256xf32> -> vector<32x256xf32>
    %c0_3 = arith.constant 0 : index
    %c0_4 = arith.constant 0 : index
    %3 = vector.load %arg3[%c0_3, %c0_4] : memref<32x256xbf16, #tpu.memory_space<vmem>>, vector<32x256xbf16>
    %c0_5 = arith.constant 0 : index
    %c0_6 = arith.constant 0 : index
    %4 = vector.load %arg5[%c0_5, %c0_6] : memref<256x256xbf16, #tpu.memory_space<vmem>>, vector<256x256xbf16>
    %cst_7 = arith.constant dense<0.000000e+00> : vector<32x256xf32>
    %5 = tpu.matmul %3, %4, %cst_7 {dimension_numbers = #tpu.dot_dimension_numbers<[1], [0], [0], [1], [0, 0, 1, 1], [], []>} : vector<32x256xbf16>, vector<256x256xbf16>, vector<32x256xf32> -> vector<32x256xf32>
    %6 = arith.addf %2, %5 : vector<32x256xf32>
    %c0_8 = arith.constant 0 : index
    %c0_9 = arith.constant 0 : index
    %7 = vector.load %arg6[%c0_8, %c0_9] : memref<1x256xf32, #tpu.memory_space<vmem>>, vector<1x256xf32>
    %8 = vector.broadcast %7 : vector<1x256xf32> to vector<32x256xf32>
    %9 = arith.addf %6, %8 : vector<32x256xf32>
    %10 = arith.truncf %9 : vector<32x256xf32> to vector<32x256xbf16>
    %c0_10 = arith.constant 0 : index
    %c0_11 = arith.constant 0 : index
    %11 = vector.load %arg7[%c0_10, %c0_11] : memref<32x256xbf16, #tpu.memory_space<vmem>>, vector<32x256xbf16>
    tpu.vector_store %arg7[%c0_10, %c0_11], %10 {strides = array<i32>} : memref<32x256xbf16, #tpu.memory_space<vmem>>, vector<32x256xbf16>,
    return
  }
  func.func @transform_0(%arg0: i32, %arg1: i32) -> (i32, i32) {
    %c0_i32 = arith.constant 0 : i32
    %c0_i32_0 = arith.constant 0 : i32
    return %arg0, %c0_i32 : i32, i32
  }
  func.func @transform_1(%arg0: i32, %arg1: i32) -> (i32, i32) {
    %c0_i32 = arith.constant 0 : i32
    %c0_i32_0 = arith.constant 0 : i32
    return %arg0, %c0_i32 : i32, i32
  }
  func.func @transform_2(%arg0: i32, %arg1: i32) -> (i32, i32) {
    %c0_i32 = arith.constant 0 : i32
    %c0_i32_0 = arith.constant 0 : i32
    return %c0_i32, %arg1 : i32, i32
  }
  func.func @transform_3(%arg0: i32, %arg1: i32) -> (i32, i32) {
    %c0_i32 = arith.constant 0 : i32
    %c0_i32_0 = arith.constant 0 : i32
    return %c0_i32, %arg1 : i32, i32
  }
  func.func @transform_4(%arg0: i32, %arg1: i32) -> (i32, i32) {
    %c0_i32 = arith.constant 0 : i32
    %c0_i32_0 = arith.constant 0 : i32
    return %c0_i32, %arg1 : i32, i32
  }
  func.func @transform_5(%arg0: i32, %arg1: i32) -> (i32, i32) {
    %c0_i32 = arith.constant 0 : i32
    return %arg0, %arg1 : i32, i32
  }
}

module attributes {stable_mosaic.version = 11 : i64} {
  func.func @kernel(%arg0: i32, %arg1: i32, %arg2: i32, %arg3: memref<1x16x256xbf16, #tpu.memory_space<vmem>>, %arg4: memref<1x16x256xbf16, #tpu.memory_space<vmem>>, %arg5: memref<1x16x16xbf16, #tpu.memory_space<vmem>>) attributes {dimension_semantics = [#tpu.dimension_semantics<parallel>, #tpu.dimension_semantics<parallel>, #tpu.dimension_semantics<parallel>], iteration_bounds = array<i64: 2, 1, 1>, scalar_prefetch = 0 : i64, scratch_operands = 0 : i64, tpu.core_type = #tpu.core_type<tc>, window_params = [{transform_indices = @transform_0, window_bounds = array<i64: 1, 16, 256>}, {transform_indices = @transform_1, window_bounds = array<i64: 1, 16, 256>}, {transform_indices = @transform_2, window_bounds = array<i64: 1, 16, 16>}]} {
    %c0 = arith.constant 0 : index
    %c0_0 = arith.constant 0 : index
    %c0_1 = arith.constant 0 : index
    %0 = vector.load %arg3[%c0, %c0_0, %c0_1] : memref<1x16x256xbf16, #tpu.memory_space<vmem>>, vector<1x16x256xbf16>
    %1 = vector.shape_cast %0 : vector<1x16x256xbf16> to vector<16x256xbf16>
    %c0_2 = arith.constant 0 : index
    %c0_3 = arith.constant 0 : index
    %c0_4 = arith.constant 0 : index
    %2 = vector.load %arg4[%c0_2, %c0_3, %c0_4] : memref<1x16x256xbf16, #tpu.memory_space<vmem>>, vector<1x16x256xbf16>
    %3 = vector.shape_cast %2 : vector<1x16x256xbf16> to vector<16x256xbf16>
    %cst = arith.constant dense<0.000000e+00> : vector<16x16xf32>
    %4 = tpu.matmul %1, %3, %cst {dimension_numbers = #tpu.dot_dimension_numbers<[1], [1], [0], [0], [0, 0, 1, 0], [], []>} : vector<16x256xbf16>, vector<16x256xbf16>, vector<16x16xf32> -> vector<16x16xf32>
    %cst_5 = arith.constant 6.250000e-02 : f32
    %5 = vector.broadcast %cst_5 : f32 to vector<16x16xf32>
    %6 = arith.mulf %4, %5 : vector<16x16xf32>
    %7 = arith.truncf %6 : vector<16x16xf32> to vector<16x16xbf16>
    %c0_6 = arith.constant 0 : index
    %c0_7 = arith.constant 0 : index
    %c0_8 = arith.constant 0 : index
    %8 = vector.load %arg5[%c0_6, %c0_7, %c0_8] : memref<1x16x16xbf16, #tpu.memory_space<vmem>>, vector<1x16x16xbf16>
    %9 = vector.shape_cast %8 : vector<1x16x16xbf16> to vector<16x16xbf16>
    %10 = vector.shape_cast %7 : vector<16x16xbf16> to vector<1x16x16xbf16>
    tpu.vector_store %arg5[%c0_6, %c0_7, %c0_8], %10 {strides = array<i32>} : memref<1x16x16xbf16, #tpu.memory_space<vmem>>, vector<1x16x16xbf16>,
    return
  }
  func.func @transform_0(%arg0: i32, %arg1: i32, %arg2: i32) -> (i32, i32, i32) {
    %c0_i32 = arith.constant 0 : i32
    %c0_i32_0 = arith.constant 0 : i32
    return %arg0, %arg1, %c0_i32 : i32, i32, i32
  }
  func.func @transform_1(%arg0: i32, %arg1: i32, %arg2: i32) -> (i32, i32, i32) {
    %c0_i32 = arith.constant 0 : i32
    %c0_i32_0 = arith.constant 0 : i32
    return %arg0, %arg2, %c0_i32 : i32, i32, i32
  }
  func.func @transform_2(%arg0: i32, %arg1: i32, %arg2: i32) -> (i32, i32, i32) {
    %c0_i32 = arith.constant 0 : i32
    return %arg0, %arg1, %arg2 : i32, i32, i32
  }
}

module attributes {stable_mosaic.version = 11 : i64} {
  func.func @kernel(%arg0: i32, %arg1: memref<2x16x1024xbf16, #tpu.memory_space<vmem>>, %arg2: memref<1024x2xf32, #tpu.memory_space<vmem>>, %arg3: memref<1x2xf32, #tpu.memory_space<vmem>>, %arg4: memref<2x2xf32, #tpu.memory_space<vmem>>, %arg5: memref<2x1024xf32, #tpu.memory_space<vmem>>) attributes {dimension_semantics = [#tpu.dimension_semantics<arbitrary>], iteration_bounds = array<i64: 1>, scalar_prefetch = 0 : i64, scratch_operands = 1 : i64, tpu.core_type = #tpu.core_type<tc>, window_params = [{transform_indices = @transform_0, window_bounds = array<i64: 2, 16, 1024>}, {pipeline_mode = #tpu.pipeline_mode<synchronous>, transform_indices = @transform_1, window_bounds = array<i64: 1024, 2>}, {pipeline_mode = #tpu.pipeline_mode<synchronous>, transform_indices = @transform_2, window_bounds = array<i64: 1, 2>}, {pipeline_mode = #tpu.pipeline_mode<synchronous>, transform_indices = @transform_3, window_bounds = array<i64: 2, 2>}]} {
    %c0_i32 = arith.constant 0 : i32
    %0 = arith.cmpi eq, %arg0, %c0_i32 : i32
    %1 = arith.extui %0 : i1 to i32
    %c0_i32_0 = arith.constant 0 : i32
    %2 = arith.cmpi ne, %1, %c0_i32_0 : i32
    scf.if %2 {
      %cst_9 = arith.constant 0.000000e+00 : f32
      %12 = vector.broadcast %cst_9 : f32 to vector<2x1024xf32>
      %c0_10 = arith.constant 0 : index
      %c0_11 = arith.constant 0 : index
      %13 = vector.load %arg5[%c0_10, %c0_11] : memref<2x1024xf32, #tpu.memory_space<vmem>>, vector<2x1024xf32>
      tpu.vector_store %arg5[%c0_10, %c0_11], %12 {strides = array<i32>} : memref<2x1024xf32, #tpu.memory_space<vmem>>, vector<2x1024xf32>,
    } else {
    }
    %c0 = arith.constant 0 : index
    %c0_1 = arith.constant 0 : index
    %3 = vector.load %arg5[%c0, %c0_1] : memref<2x1024xf32, #tpu.memory_space<vmem>>, vector<2x1024xf32>
    %c0_2 = arith.constant 0 : index
    %c0_3 = arith.constant 0 : index
    %c0_4 = arith.constant 0 : index
    %4 = vector.load %arg1[%c0_2, %c0_3, %c0_4] : memref<2x16x1024xbf16, #tpu.memory_space<vmem>>, vector<2x16x1024xbf16>
    %5 = arith.extf %4 : vector<2x16x1024xbf16> to vector<2x16x1024xf32>
    %cst = arith.constant dense<0.000000e+00> : vector<2x1024xf32>
    %6 = vector.multi_reduction <add>, %5, %cst [1] : vector<2x16x1024xf32> to vector<2x1024xf32>
    %7 = arith.addf %3, %6 : vector<2x1024xf32>
    %c0_5 = arith.constant 0 : index
    %c0_6 = arith.constant 0 : index
    %8 = vector.load %arg5[%c0_5, %c0_6] : memref<2x1024xf32, #tpu.memory_space<vmem>>, vector<2x1024xf32>
    tpu.vector_store %arg5[%c0_5, %c0_6], %7 {strides = array<i32>} : memref<2x1024xf32, #tpu.memory_space<vmem>>, vector<2x1024xf32>,
    %c0_i32_7 = arith.constant 0 : i32
    %9 = arith.cmpi eq, %arg0, %c0_i32_7 : i32
    %10 = arith.extui %9 : i1 to i32
    %c0_i32_8 = arith.constant 0 : i32
    %11 = arith.cmpi ne, %10, %c0_i32_8 : i32
    scf.if %11 {
      %c0_9 = arith.constant 0 : index
      %c0_10 = arith.constant 0 : index
      %12 = vector.load %arg5[%c0_9, %c0_10] : memref<2x1024xf32, #tpu.memory_space<vmem>>, vector<2x1024xf32>
      %cst_11 = arith.constant 6.250000e-02 : f32
      %13 = vector.broadcast %cst_11 : f32 to vector<2x1024xf32>
      %14 = arith.mulf %12, %13 : vector<2x1024xf32>
      %c0_12 = arith.constant 0 : index
      %c0_13 = arith.constant 0 : index
      %15 = vector.load %arg2[%c0_12, %c0_13] : memref<1024x2xf32, #tpu.memory_space<vmem>>, vector<1024x2xf32>
      %cst_14 = arith.constant dense<0.000000e+00> : vector<2x2xf32>
      %16 = tpu.matmul %14, %15, %cst_14 {dimension_numbers = #tpu.dot_dimension_numbers<[1], [0], [0], [1], [0, 0, 1, 1], [], []>} : vector<2x1024xf32>, vector<1024x2xf32>, vector<2x2xf32> -> vector<2x2xf32>
      %c0_15 = arith.constant 0 : index
      %c0_16 = arith.constant 0 : index
      %17 = vector.load %arg3[%c0_15, %c0_16] : memref<1x2xf32, #tpu.memory_space<vmem>>, vector<1x2xf32>
      %18 = vector.broadcast %17 : vector<1x2xf32> to vector<2x2xf32>
      %19 = arith.addf %16, %18 : vector<2x2xf32>
      %c0_17 = arith.constant 0 : index
      %c0_18 = arith.constant 0 : index
      %20 = vector.load %arg4[%c0_17, %c0_18] : memref<2x2xf32, #tpu.memory_space<vmem>>, vector<2x2xf32>
      tpu.vector_store %arg4[%c0_17, %c0_18], %19 {strides = array<i32>} : memref<2x2xf32, #tpu.memory_space<vmem>>, vector<2x2xf32>,
    } else {
    }
    return
  }
  func.func @transform_0(%arg0: i32) -> (i32, i32, i32) {
    %c0_i32 = arith.constant 0 : i32
    %c0_i32_0 = arith.constant 0 : i32
    %c0_i32_1 = arith.constant 0 : i32
    return %c0_i32, %arg0, %c0_i32_0 : i32, i32, i32
  }
  func.func @transform_1(%arg0: i32) -> (i32, i32) {
    %c0_i32 = arith.constant 0 : i32
    %c0_i32_0 = arith.constant 0 : i32
    %c0_i32_1 = arith.constant 0 : i32
    return %c0_i32, %c0_i32_0 : i32, i32
  }
  func.func @transform_2(%arg0: i32) -> (i32, i32) {
    %c0_i32 = arith.constant 0 : i32
    %c0_i32_0 = arith.constant 0 : i32
    %c0_i32_1 = arith.constant 0 : i32
    return %c0_i32, %c0_i32_0 : i32, i32
  }
  func.func @transform_3(%arg0: i32) -> (i32, i32) {
    %c0_i32 = arith.constant 0 : i32
    %c0_i32_0 = arith.constant 0 : i32
    %c0_i32_1 = arith.constant 0 : i32
    return %c0_i32, %c0_i32_0 : i32, i32
  }
}

</mosaic_0001>

<bundles_post_ra>
// kernel: flowformer_forward.6
= control target key start
LH: loop header
LB: loop body
LE: loop exit
PB: predicated region body
PF: predicated region fallthrough
CT: control target
= control target key end

     0   :  { %vm183_vm0 = vcmask 523264   ;;  %v53_v36 = vlaneseq  ;;  %s500_s1 = inlined_call_operand.vmem [shape: bf16[192,256], index: 1, kind: input, shape index: {}]   ;;  %s501_s0 = inlined_call_operand.vmem [shape: f32[32,192], index: 0, kind: input, shape index: {}]   ;;  %s502_s2 = inlined_call_operand.vmem [shape: f32[1,256], index: 2, kind: input, shape index: {}]   ;;  %s503_s3 = inlined_call_operand.vmem [shape: bf16[32,256], index: 3, kind: output, shape index: {}]  }
   0x1   :  { %v333_v0 = vld [vmem:[%s500_s1 + $0x74] ss:$8 sps:$4 sm:$0xff]   ;;  %v335_v1 = vld [vmem:[%s500_s1 + $0x70] ss:$8 sps:$4 sm:$0xff]   ;;  %v336_v2 = vld [vmem:[%s500_s1 + $0x64] ss:$8 sps:$4 sm:$0xff]  }
   0x2   :  { %190 = vmatprep.subr.bf16.mxu0 %v333_v0  ;;  %309 = vmatprep.subr.bf16.mxu1 %v333_v0  ;;  %v338_v3 = vld [vmem:[%s500_s1 + $0x60] ss:$8 sps:$4 sm:$0xff]   ;;  %v339_v4 = vld [vmem:[%s500_s1 + $0x54] ss:$8 sps:$4 sm:$0xff]   ;;  %v341_v5 = vld [vmem:[%s500_s1 + $0x50] ss:$8 sps:$4 sm:$0xff]  }
   0x3   :  { %191 = vmatpush1.bf16.msra.mxu0 %v335_v1  ;;  %321 = vmatpush1.bf16.msra.mxu1 %v335_v1  ;;  %v342_v6 = vld [vmem:[%s500_s1 + $0x44] ss:$8 sps:$4 sm:$0xff]   ;;  %v344_v7 = vld [vmem:[%s500_s1 + $0x40] ss:$8 sps:$4 sm:$0xff]   ;;  %v345_v8 = vld [vmem:[%s500_s1 + $0x34] ss:$8 sps:$4 sm:$0xff]  }
   0x4   :  { %192 = vmatprep.subr.bf16.mxu0 %v336_v2  ;;  %310 = vmatprep.subr.bf16.mxu1 %v336_v2  ;;  %v347_v9 = vld [vmem:[%s500_s1 + $0x30] ss:$8 sps:$4 sm:$0xff]   ;;  %v348_v10 = vld [vmem:[%s500_s1 + $0x24] ss:$8 sps:$4 sm:$0xff]   ;;  %v350_v17 = vld [vmem:[%s500_s1 + $0x20] ss:$8 sps:$4 sm:$0xff]  }
   0x5   :  { %v16_v11 = vld [vmem:[%s501_s0 + $0x8] sm:$0xff]  ;;  %v18_v12 = vld [vmem:[%s501_s0 + $0x18] sm:$0xff]  ;;  %v15_v30 = vld [vmem:[%s501_s0] sm:$0xff]  ;;  %v54_v37 = vshrl.u32 %v53_v36, 7 }
   0x6   :  { %v20_v13 = vld [vmem:[%s501_s0 + $0x28] sm:$0xff]  ;;  %v24_v14 = vpack.c.bf16 %v18_v12, %v16_v11  ;;  %v22_v15 = vld [vmem:[%s501_s0 + $0x38] sm:$0xff]  ;;  %v17_v31 = vld [vmem:[%s501_s0 + $0x10] sm:$0xff] }
   0x7   :  { %193 = vmatpush1.bf16.msra.mxu0 %v338_v3  ;;  %322 = vmatpush1.bf16.msra.mxu1 %v338_v3  ;;  %v26_v16 = vpack.c.bf16 %v22_v15, %v20_v13  ;;  %v351_v18 = vld [vmem:[%s500_s1 + $0x14] ss:$8 sps:$4 sm:$0xff]   ;;  %v353_v19 = vld [vmem:[%s500_s1 + $0x10] ss:$8 sps:$4 sm:$0xff]   ;;  %v354_v20 = vld [vmem:[%s500_s1 + $0x4] ss:$8 sps:$4 sm:$0xff]   ;;  %v23_v34 = vpack.c.bf16 %v17_v31, %v15_v30 }
   0x8   :  { %194 = vmatprep.subr.bf16.mxu0 %v339_v4  ;;  %311 = vmatprep.subr.bf16.mxu1 %v339_v4  ;;  %v356_v21 = vld [vmem:[%s500_s1] ss:$8 sps:$4 sm:$0xff]   ;;  %v357_v22 = vld [vmem:[%s500_s1 + $0xb4] ss:$8 sps:$4 sm:$0xff]   ;;  %v359_v23 = vld [vmem:[%s500_s1 + $0xb0] ss:$8 sps:$4 sm:$0xff]  }
   0x9   :  { %299 = vmatprep.mubr.msk.bf16.mxu0 %vm183_vm0, %v24_v14  ;;  %300 = vmatprep.mubr.msk.bf16.mxu1 %vm183_vm0, %v26_v16  ;;  %v360_v24 = vld [vmem:[%s500_s1 + $0xa4] ss:$8 sps:$4 sm:$0xff]   ;;  %v362_v25 = vld [vmem:[%s500_s1 + $0xa0] ss:$8 sps:$4 sm:$0xff]   ;;  %v363_v26 = vld [vmem:[%s500_s1 + $0x94] ss:$8 sps:$4 sm:$0xff]  }
   0xa   :  { %v365_v27 = vld [vmem:[%s500_s1 + $0x90] ss:$8 sps:$4 sm:$0xff]   ;;  %v366_v28 = vld [vmem:[%s500_s1 + $0x84] ss:$8 sps:$4 sm:$0xff]   ;;  %v368_v29 = vld [vmem:[%s500_s1 + $0x80] ss:$8 sps:$4 sm:$0xff]  }
   0xb   :  { %195 = vmatpush1.bf16.msra.mxu0 %v341_v5  ;;  %323 = vmatpush1.bf16.msra.mxu1 %v341_v5  ;;  %v19_v32 = vld [vmem:[%s501_s0 + $0x20] sm:$0xff]  ;;  %v21_v33 = vld [vmem:[%s501_s0 + $0x30] sm:$0xff]  ;;  %v55_v38 = vsub.s32 0, %v54_v37  ;;  %v59_v39 = vsub.s32 1, %v54_v37 }
   0xc   :  { %196 = vmatprep.subr.bf16.mxu0 %v342_v6  ;;  %312 = vmatprep.subr.bf16.mxu1 %v342_v6  ;;  %v25_v35 = vpack.c.bf16 %v21_v33, %v19_v32  ;;  %v51_v40 = vld [vmem:[%s502_s2] sm:$0x3] }
   0xd   :  { %v56_v41 = vrot.slane %v51_v40, %v55_v38  ;;  %v60_v42 = vrot.slane %v51_v40, %v59_v39 }
   0xf   :  { %197 = vmatpush1.bf16.msra.mxu0 %v344_v7  ;;  %324 = vmatpush1.bf16.msra.mxu1 %v344_v7 }
  0x10   :  { %198 = vmatprep.subr.bf16.mxu0 %v345_v8  ;;  %313 = vmatprep.subr.bf16.mxu1 %v345_v8 }
  0x13   :  { %199 = vmatpush1.bf16.msra.mxu0 %v347_v9  ;;  %325 = vmatpush1.bf16.msra.mxu1 %v347_v9 }
  0x14   :  { %200 = vmatprep.subr.bf16.mxu0 %v348_v10  ;;  %314 = vmatprep.subr.bf16.mxu1 %v348_v10 }
  0x17   :  { %201 = vmatpush1.bf16.msra.mxu0 %v350_v17  ;;  %326 = vmatpush1.bf16.msra.mxu1 %v350_v17 }
  0x18   :  { %202 = vmatprep.subr.bf16.mxu0 %v351_v18  ;;  %315 = vmatprep.subr.bf16.mxu1 %v351_v18 }
  0x1b   :  { %203 = vmatpush1.bf16.msra.mxu0 %v353_v19  ;;  %327 = vmatpush1.bf16.msra.mxu1 %v353_v19 }
  0x1c   :  { %204 = vmatprep.subr.bf16.mxu0 %v354_v20  ;;  %316 = vmatprep.subr.bf16.mxu1 %v354_v20 }
  0x1f   :  { %205 = vmatpush1.bf16.msra.mxu0 %v356_v21  ;;  %328 = vmatpush1.bf16.msra.mxu1 %v356_v21 }
  0x20   :  { %214 = vmatprep.subr.bf16.mxu0 %v357_v22  ;;  %317 = vmatprep.subr.bf16.mxu1 %v357_v22 }
  0x23   :  { %215 = vmatpush2.bf16.msra.mxu0 %v359_v23  ;;  %329 = vmatpush2.bf16.msra.mxu1 %v359_v23 }
  0x24   :  { %216 = vmatprep.subr.bf16.mxu0 %v360_v24  ;;  %318 = vmatprep.subr.bf16.mxu1 %v360_v24 }
  0x27   :  { %217 = vmatpush2.bf16.msra.mxu0 %v362_v25  ;;  %330 = vmatpush2.bf16.msra.mxu1 %v362_v25 }
  0x28   :  { %218 = vmatprep.subr.bf16.mxu0 %v363_v26  ;;  %319 = vmatprep.subr.bf16.mxu1 %v363_v26 }
  0x2b   :  { %219 = vmatpush2.bf16.msra.mxu0 %v365_v27  ;;  %331 = vmatpush2.bf16.msra.mxu1 %v365_v27 }
  0x2c   :  { %220 = vmatprep.subr.bf16.mxu0 %v366_v28  ;;  %320 = vmatprep.subr.bf16.mxu1 %v366_v28 }
  0x2f   :  { %221 = vmatpush2.bf16.msra.mxu0 %v368_v29  ;;  %332 = vmatpush2.bf16.msra.mxu1 %v368_v29 }
  0x32   :  { %223 = vmatmul.mubr.bf16.vlgmr.msra.gmra.mxu0 %v23_v34  ;;  %233 = vmatmul.mubr.bf16.vlgmr.msra.gmra.mxu1 %v25_v35 }
  0xf2   :  { %v224_v43 = vpop.f32.mrf.mxu0  ;;  %v234_v44 = vpop.f32.mrf.mxu1 }
  0xf3   :  { %v225_v47 = vadd.f32 %v224_v43, %v56_v41  ;;  %v235_v48 = vadd.f32 %v234_v44, %v56_v41 }
  0xf4   :  { %v226_v45 = vpop.f32.mrf.mxu0  ;;  %v236_v46 = vpop.f32.mrf.mxu1 }
  0xf5   :  { %v227_v49 = vadd.f32 %v226_v45, %v60_v42  ;;  %v237_v50 = vadd.f32 %v236_v46, %v60_v42 }
  0xf6   :  { %v228_v51 = vpop.f32.mrf.mxu0  ;;  %v238_v52 = vpop.f32.mrf.mxu1 }
  0xf7   :  { %v305_v53 = vpack.c.bf16 %v227_v49, %v225_v47  ;;  %v307_v54 = vpack.c.bf16 %v237_v50, %v235_v48  ;;  %v229_v57 = vadd.f32 %v228_v51, %v56_v41  ;;  %v239_v58 = vadd.f32 %v238_v52, %v56_v41 }
  0xf8   :  { %v230_v55 = vpop.f32.mrf.mxu0  ;;  %v240_v56 = vpop.f32.mrf.mxu1 }
  0xf9   :  { %267 = vst [vmem:[%s503_s3] sm:$0xff] %v305_v53  ;;  %269 = vst [vmem:[%s503_s3 + $0x10] sm:$0xff] %v307_v54  ;;  %v231_v59 = vadd.f32 %v230_v55, %v60_v42  ;;  %v241_v60 = vadd.f32 %v240_v56, %v60_v42 }
  0xfb   :  { %v306_v61 = vpack.c.bf16 %v231_v59, %v229_v57  ;;  %v308_v62 = vpack.c.bf16 %v241_v60, %v239_v58 }
  0xfd   :  { %268 = vst [vmem:[%s503_s3 + $0x8] sm:$0xff] %v306_v61  ;;  %270 = vst [vmem:[%s503_s3 + $0x18] sm:$0xff] %v308_v62 }

// kernel: flowformer_forward.9
= control target key start
LH: loop header
LB: loop body
LE: loop exit
PB: predicated region body
PF: predicated region fallthrough
CT: control target
= control target key end

     0   :  { %s536_s9 = smov 0   ;;  %s538_s10 = smov 0   ;;  %s572_s0 = inlined_call_operand.vmem [shape: bf16[2,16,256], index: 0, kind: input, shape index: {}]   ;;  %s573_s1 = inlined_call_operand.vmem [shape: bf16[2,16,256], index: 1, kind: input, shape index: {}]   ;;  %s574_s2 = inlined_call_operand.vmem [shape: bf16[2,16,16], index: 2, kind: output, shape index: {}]  }
   0x1   :  { %s540_s11 = smov 0  }
   0x2 LB: > { %s31_s12 = sadd.s32 1, %s515_s10  ;;  %p447_p0 = scmp.ge.s32.totalorder %s519_s11, 1  ;;  %s519_s11 = sphi %s540_s11, %s12_s11   ;;  %s515_s10 = sphi %s538_s10, %s576_s10   ;;  %s511_s9 = sphi %s536_s9, %s575_s9  }
   0x3   : > { %p33_p1 = scmp.ge.s32.totalorder %s31_s12, 2  ;;  %p161_p2 = scmp.lt.s32.totalorder %s519_s11, 3 }
   0x5   : > { %s578_s12 = smov (%p33_p1, %s31_s12), 0  ;;  %p162_p3 = pnand %p447_p0, %p161_p2 }
   0x6   : > { %p206_p4 = scmp.lt.s32.totalorder (!%p162_p3), %s511_s9, 1 }
   0x7   : > { %165 = sbr.rel (%p162_p3) target bundleno = 226 (0xe2), region = 28 }
   0xc   : > { %s580_s9 = smov (!%p206_p4, %s511_s9), 1  ;;  %vm316_vm0 = vcmask 125952  }
   0xd   : > { %s462_s13 = sshll.u32 %s580_s9, 4  ;;  %s464_s20 = sshll.u32 %s580_s9, 3 }
   0xe   : > { %s225_s16 = scalar_lea.vmem %s573_s1, %s462_s13  ;;  %s214_s19 = scalar_lea.vmem %s572_s0, %s462_s13 }
   0xf   : > { %v491_v0 = vld [vmem:[%s225_s16 + $0x4] ss:$8 sps:$4 sm:$0xff]   ;;  %v493_v1 = vld [vmem:[%s225_s16] ss:$8 sps:$4 sm:$0xff]   ;;  %s238_s23 = scalar_lea.vmem %s574_s2, %s464_s20 }
  0x10   : > { %279 = vmatprep.subr.bf16.mxu0 %v491_v0  ;;  %v496_v2 = vld [vmem:[%s214_s19 + $0x4] ss:$8 sps:$4 sm:$0xff]   ;;  %v494_v3 = vld [vmem:[%s214_s19] ss:$8 sps:$4 sm:$0xff]  }
  0x11   : > { %280 = vmatpush1.bf16.xpose.msra.mxu0 %v493_v1  ;;  %297 = vmatprep.mubr.bf16.mxu0 %v496_v2 }
  0x18   : > { %298 = vmatmul.mubr.bf16.vlgmr.msra.gmra.mxu0 %v494_v3 }
  0xd8   : > { %v299_v4 = vpop.f32.mrf.mxu0 }
  0xd9   : > { %v306_v5 = vmul.f32 0.0625, %v299_v4 }
  0xda   : > { %v301_v6 = vpop.f32.mrf.mxu0 }
  0xdb   : > { %v465_v7 = vpack.c.bf16 %v306_v5, %v306_v5 }
  0xdc   : > { %v302_v8 = vpop.f32.mrf.mxu0 }
  0xdd   : > { %317 = vst.msk [vmem:[%s238_s23] sm:$0xf] %vm316_vm0, %v465_v7  ;;  %v307_v9 = vmul.f32 0.0625, %v302_v8 }
  0xde   : > { %v304_v10 = vpop.f32.mrf.mxu0 }
  0xdf   : > { %v466_v11 = vpack.c.bf16 %v307_v9, %v307_v9 }
  0xe1   : > { %318 = vst.msk [vmem:[%s238_s23 + $0x4] sm:$0xf] %vm316_vm0, %v466_v11 }
  0xe2 PF: > { %s12_s11 = sadd.s32 1, %s519_s11   ;;  %s575_s9 = smov %s515_s10 }
  0xe3   : > { %p9_p5 = scmp.ge.s32.totalorder %s12_s11, 4   ;;  %s576_s10 = smov %s578_s12 }
  0xe5   :  { %11 = sbr.rel (!%p9_p5) target bundleno = 2 (0x2), region = 61 }

// kernel: flowformer_forward.10
= control target key start
LH: loop header
LB: loop body
LE: loop exit
PB: predicated region body
PF: predicated region fallthrough
CT: control target
= control target key end

     0   :  { %s1356_s18 = smov 0   ;;  %s1358_s19 = smov 0   ;;  %s1582_s0 = inlined_call_operand.vmem [shape: bf16[32,16], index: 0, kind: input, shape index: {}]   ;;  %s1583_s1 = inlined_call_operand.vmem [shape: bf16[32,256], index: 1, kind: input, shape index: {}]   ;;  %s1584_s2 = inlined_call_operand.vmem [shape: bf16[16,1024], index: 2, kind: input, shape index: {}]   ;;  %s1585_s3 = inlined_call_operand.vmem [shape: bf16[256,1024], index: 3, kind: input, shape index: {}]   ;;  %s1586_s4 = inlined_call_operand.vmem [shape: f32[1,1024], index: 4, kind: input, shape index: {}]   ;;  %s1587_s5 = inlined_call_operand.vmem [shape: bf16[32,1024], index: 5, kind: output, shape index: {}]  }
   0x1   :  { %s1360_s20 = smov 0   ;;  %s1362_s21 = smov 0  }
   0x2   :  { %s1364_s22 = smov 0  }
   0x3 LB: > { %s24_s23 = sadd.s32 1, %s1319_s21  ;;  %s1110_s24 = sadd.s32 4294967295, %s1323_s22   ;;  %s1323_s22 = sphi %s1364_s22, %s15_s22   ;;  %s1319_s21 = sphi %s1362_s21, %s1593_s21   ;;  %s1315_s20 = sphi %s1360_s20, %s1592_s20   ;;  %s1311_s19 = sphi %s1358_s19, %s1591_s19   ;;  %s1307_s18 = sphi %s1356_s18, %s1590_s18  }
   0x4   : > { %p25_p0 = scmp.ge.s32.totalorder %s24_s23, 4  ;;  %p93_p1 = scmp.ne.s32.totalorder %s1311_s19, %s1307_s18 }
   0x5   : > { %p94_p2 = scmp.eq.s32.totalorder %s1323_s22, 0  ;;  %p177_p4 = scmp.eq.s32.totalorder %s1110_s24, 3 }
   0x6   : > { %s1595_s23 = smov (%p25_p0, %s24_s23), 0  ;;  %s86_s27 = sadd.s32 1, %s1311_s19 }
   0x7   : > { %p1388_p3 = por %p94_p2, %p93_p1  ;;  %s83_s26 = ssub.s32 %s1319_s21, %s1595_s23 }
   0x8   : > { %p84_p5 = scmp.eq.s32.totalorder %s83_s26, 0  ;;  %p1395_p6 = por %p177_p4, %p93_p1 }
   0x9   : > { %p1115_p7 = scmp.ge.s32.totalorder %s1323_s22, 4 }
   0xa   : > { %s1400_s29 = scalar_select %p84_p5, %s1311_s19, %s86_s27  }
   0xb   : > { %218 = sbr.rel (%p1115_p7) target bundleno = 58 (0x3a), region = 24 }
  0x10   : > { %221 = sbr.rel (!%p1388_p3) target bundleno = 22 (0x16), region = 28  ;;  %s223_s30 = sand.u32 (%p1388_p3), 1, %s1311_s19  }
  0x11   : > { %s1178_s6 = sshll.u32 (%p1388_p3), %s1319_s21, 3  ;;  %s1116_s7 = sshll.u32 (%p1388_p3), %s223_s30, 4 }
  0x12   : > { %s228_s10 = scalar_lea.vmem (%p1388_p3), %s1584_s2, %s1178_s6  ;;  %s225_s11 = scalar_lea.vmem (%p1388_p3), [#allocation2], %s1116_s7 }
  0x13   : > { %v259_v0 = vld [vmem:[%s228_s10] sm:$0xff] (%p1388_p3) }
  0x14   : > { %v261_v1 = vld [vmem:[%s228_s10 + $0x20] sm:$0xff] (%p1388_p3)  ;;  %260 = vst [vmem:[%s225_s11] sm:$0xff] (%p1388_p3), %v259_v0 }
  0x15   : > { %262 = vst [vmem:[%s225_s11 + $0x8] sm:$0xff] %v261_v1 }
  0x16 PF: > { %268 = sbr.rel (!%p1388_p3) target bundleno = 58 (0x3a), region = 66  ;;  %s270_s12 = sand.u32 (%p1388_p3), 1, %s1311_s19  }
  0x17   : > { %s1179_s13 = sshll.u32 (%p1388_p3), %s1319_s21, 3  ;;  %s1119_s14 = sshll.u32 (%p1388_p3), %s270_s12, 8 }
  0x18   : > { %s1417_s17 = scalar_lea.vmem (%p1388_p3), %s1585_s3, %s1179_s13  ;;  %s1422_s24 = scalar_lea.vmem (%p1388_p3), [#allocation3], %s1119_s14 }
  0x19   : > { %v366_v2 = vld [vmem:[%s1417_s17] sm:$0xff] (%p1388_p3) }
  0x1a   : > { %v368_v3 = vld [vmem:[%s1417_s17 + $0x20] sm:$0xff] (%p1388_p3)  ;;  %367 = vst [vmem:[%s1422_s24] sm:$0xff] (%p1388_p3), %v366_v2 }
  0x1b   : > { %v370_v4 = vld [vmem:[%s1417_s17 + $0x40] sm:$0xff]  ;;  %369 = vst [vmem:[%s1422_s24 + $0x8] sm:$0xff] %v368_v3 }
  0x1c   : > { %371 = vst [vmem:[%s1422_s24 + $0x10] sm:$0xff] %v370_v4  ;;  %v372_v5 = vld [vmem:[%s1417_s17 + $0x60] sm:$0xff] }
  0x1d   : > { %v374_v6 = vld [vmem:[%s1417_s17 + $0x80] sm:$0xff]  ;;  %373 = vst [vmem:[%s1422_s24 + $0x18] sm:$0xff] %v372_v5 }
  0x1e   : > { %v376_v7 = vld [vmem:[%s1417_s17 + $0xa0] sm:$0xff]  ;;  %375 = vst [vmem:[%s1422_s24 + $0x20] sm:$0xff] %v374_v6 }
  0x1f   : > { %377 = vst [vmem:[%s1422_s24 + $0x28] sm:$0xff] %v376_v7  ;;  %v378_v8 = vld [vmem:[%s1417_s17 + $0xc0] sm:$0xff] }
  0x20   : > { %v380_v9 = vld [vmem:[%s1417_s17 + $0xe0] sm:$0xff]  ;;  %379 = vst [vmem:[%s1422_s24 + $0x30] sm:$0xff] %v378_v8 }
  0x21   : > { %v382_v10 = vld [vmem:[%s1417_s17 + $0x100] sm:$0xff]  ;;  %381 = vst [vmem:[%s1422_s24 + $0x38] sm:$0xff] %v380_v9 }
  0x22   : > { %383 = vst [vmem:[%s1422_s24 + $0x40] sm:$0xff] %v382_v10  ;;  %v384_v11 = vld [vmem:[%s1417_s17 + $0x120] sm:$0xff] }
  0x23   : > { %v386_v12 = vld [vmem:[%s1417_s17 + $0x140] sm:$0xff]  ;;  %385 = vst [vmem:[%s1422_s24 + $0x48] sm:$0xff] %v384_v11 }
  0x24   : > { %v388_v13 = vld [vmem:[%s1417_s17 + $0x160] sm:$0xff]  ;;  %387 = vst [vmem:[%s1422_s24 + $0x50] sm:$0xff] %v386_v12 }
  0x25   : > { %389 = vst [vmem:[%s1422_s24 + $0x58] sm:$0xff] %v388_v13  ;;  %v390_v14 = vld [vmem:[%s1417_s17 + $0x180] sm:$0xff] }
  0x26   : > { %v392_v15 = vld [vmem:[%s1417_s17 + $0x1a0] sm:$0xff]  ;;  %391 = vst [vmem:[%s1422_s24 + $0x60] sm:$0xff] %v390_v14 }
  0x27   : > { %v394_v16 = vld [vmem:[%s1417_s17 + $0x1c0] sm:$0xff]  ;;  %393 = vst [vmem:[%s1422_s24 + $0x68] sm:$0xff] %v392_v15 }
  0x28   : > { %395 = vst [vmem:[%s1422_s24 + $0x70] sm:$0xff] %v394_v16  ;;  %v396_v17 = vld [vmem:[%s1417_s17 + $0x1e0] sm:$0xff] }
  0x29   : > { %v398_v18 = vld [vmem:[%s1417_s17 + $0x200] sm:$0xff]  ;;  %397 = vst [vmem:[%s1422_s24 + $0x78] sm:$0xff] %v396_v17 }
  0x2a   : > { %v400_v19 = vld [vmem:[%s1417_s17 + $0x220] sm:$0xff]  ;;  %399 = vst [vmem:[%s1422_s24 + $0x80] sm:$0xff] %v398_v18 }
  0x2b   : > { %401 = vst [vmem:[%s1422_s24 + $0x88] sm:$0xff] %v400_v19  ;;  %v402_v20 = vld [vmem:[%s1417_s17 + $0x240] sm:$0xff] }
  0x2c   : > { %v404_v21 = vld [vmem:[%s1417_s17 + $0x260] sm:$0xff]  ;;  %403 = vst [vmem:[%s1422_s24 + $0x90] sm:$0xff] %v402_v20 }
  0x2d   : > { %v406_v22 = vld [vmem:[%s1417_s17 + $0x280] sm:$0xff]  ;;  %405 = vst [vmem:[%s1422_s24 + $0x98] sm:$0xff] %v404_v21 }
  0x2e   : > { %407 = vst [vmem:[%s1422_s24 + $0xa0] sm:$0xff] %v406_v22  ;;  %v408_v23 = vld [vmem:[%s1417_s17 + $0x2a0] sm:$0xff] }
  0x2f   : > { %v410_v24 = vld [vmem:[%s1417_s17 + $0x2c0] sm:$0xff]  ;;  %409 = vst [vmem:[%s1422_s24 + $0xa8] sm:$0xff] %v408_v23 }
  0x30   : > { %v412_v25 = vld [vmem:[%s1417_s17 + $0x2e0] sm:$0xff]  ;;  %411 = vst [vmem:[%s1422_s24 + $0xb0] sm:$0xff] %v410_v24 }
  0x31   : > { %413 = vst [vmem:[%s1422_s24 + $0xb8] sm:$0xff] %v412_v25  ;;  %v414_v26 = vld [vmem:[%s1417_s17 + $0x300] sm:$0xff] }
  0x32   : > { %v416_v27 = vld [vmem:[%s1417_s17 + $0x320] sm:$0xff]  ;;  %415 = vst [vmem:[%s1422_s24 + $0xc0] sm:$0xff] %v414_v26 }
  0x33   : > { %v418_v28 = vld [vmem:[%s1417_s17 + $0x340] sm:$0xff]  ;;  %417 = vst [vmem:[%s1422_s24 + $0xc8] sm:$0xff] %v416_v27 }
  0x34   : > { %419 = vst [vmem:[%s1422_s24 + $0xd0] sm:$0xff] %v418_v28  ;;  %v420_v29 = vld [vmem:[%s1417_s17 + $0x360] sm:$0xff] }
  0x35   : > { %v422_v30 = vld [vmem:[%s1417_s17 + $0x380] sm:$0xff]  ;;  %421 = vst [vmem:[%s1422_s24 + $0xd8] sm:$0xff] %v420_v29 }
  0x36   : > { %v424_v31 = vld [vmem:[%s1417_s17 + $0x3a0] sm:$0xff]  ;;  %423 = vst [vmem:[%s1422_s24 + $0xe0] sm:$0xff] %v422_v30 }
  0x37   : > { %425 = vst [vmem:[%s1422_s24 + $0xe8] sm:$0xff] %v424_v31  ;;  %v426_v32 = vld [vmem:[%s1417_s17 + $0x3c0] sm:$0xff] }
  0x38   : > { %v428_v33 = vld [vmem:[%s1417_s17 + $0x3e0] sm:$0xff]  ;;  %427 = vst [vmem:[%s1422_s24 + $0xf0] sm:$0xff] %v426_v32 }
  0x39   : > { %429 = vst [vmem:[%s1422_s24 + $0xf8] sm:$0xff] %v428_v33 }
  0x3a PF: > { %p1122_p8 = scmp.ge.s32.totalorder %s1323_s22, 1  ;;  %p442_p9 = scmp.lt.s32.totalorder %s1323_s22, 5 }
  0x3c   : > { %p443_p10 = pnand %p1122_p8, %p442_p9 }
  0x3d   : > { %s1488_s25 = sand.u32 (!%p443_p10), 1, %s1307_s18   ;;  %s1126_s24 = sshll.u32 (!%p443_p10), %s1315_s20, 1 }
  0x3e   : > { %446 = sbr.rel (%p443_p10) target bundleno = 355 (0x163), region = 108  ;;  %s1124_s26 = sshll.u32 (!%p443_p10), %s1488_s25, 8 }
  0x3f   : > { %s1494_s6 = scalar_lea.vmem (!%p443_p10), [#allocation3], %s1124_s26  ;;  %s1123_s18 = sshll.u32 (!%p443_p10), %s1488_s25, 4 }
  0x40   : > { %s451_s7 = scalar_lea.vmem (!%p443_p10), [#allocation2], %s1123_s18  ;;  %p517_p11 = scmp.lt.s32.totalorder (!%p443_p10), %s1126_s24, 7 }
  0x43   : > { %v1325_v34 = vmov 0   ;;  %v1280_v35 = vld [vmem:[%s1583_s1 + $0x4] ss:$8 sps:$4 sm:$0xff]   ;;  %v1226_v36 = vld [vmem:[%s1494_s6 + $0x74] ss:$8 sps:$4 sm:$0xff]   ;;  %vm819_vm0 = vcmask 130048   ;;  %v881_v12 = vlaneseq }
  0x44   : > { %858 = vmatprep.mubr.bf16.mxu1 %v1325_v34  ;;  %v1228_v37 = vld [vmem:[%s1494_s6 + $0x70] ss:$8 sps:$4 sm:$0xff]   ;;  %778 = vmatprep.mubr.bf16.mxu0 %v1280_v35  ;;  %v1229_v38 = vld [vmem:[%s1494_s6 + $0x64] ss:$8 sps:$4 sm:$0xff]   ;;  %v1231_v39 = vld [vmem:[%s1494_s6 + $0x60] ss:$8 sps:$4 sm:$0xff]  }
  0x45   : > { %746 = vmatprep.subr.bf16.mxu0 %v1226_v36  ;;  %v1232_v40 = vld [vmem:[%s1494_s6 + $0x54] ss:$8 sps:$4 sm:$0xff]   ;;  %v1234_v41 = vld [vmem:[%s1494_s6 + $0x50] ss:$8 sps:$4 sm:$0xff]   ;;  %v1235_v42 = vld [vmem:[%s1494_s6 + $0x44] ss:$8 sps:$4 sm:$0xff]  }
  0x46   : > { %747 = vmatpush1.bf16.msra.mxu0 %v1228_v37  ;;  %v1237_v43 = vld [vmem:[%s1494_s6 + $0x40] ss:$8 sps:$4 sm:$0xff]   ;;  %v1238_v44 = vld [vmem:[%s1494_s6 + $0x34] ss:$8 sps:$4 sm:$0xff]   ;;  %v1240_v45 = vld [vmem:[%s1494_s6 + $0x30] ss:$8 sps:$4 sm:$0xff]  }
  0x47   : > { %748 = vmatprep.subr.bf16.mxu0 %v1229_v38  ;;  %v1241_v46 = vld [vmem:[%s1494_s6 + $0x24] ss:$8 sps:$4 sm:$0xff]   ;;  %v1243_v47 = vld [vmem:[%s1494_s6 + $0x20] ss:$8 sps:$4 sm:$0xff]   ;;  %v1244_v50 = vld [vmem:[%s1494_s6 + $0x14] ss:$8 sps:$4 sm:$0xff]  }
  0x48   : > { %v1268_v48 = vld [vmem:[%s451_s7 + $0x4] ss:$8 sps:$4 sm:$0xff]   ;;  %v1270_v49 = vld [vmem:[%s451_s7] ss:$8 sps:$4 sm:$0xff]   ;;  %s1597_s24 = smov (!%p517_p11, %s1126_s24), 7  ;;  %v882_v14 = vshrl.u32 %v881_v12, 7 }
  0x49   : > { %840 = vmatprep.subr.bf16.mxu1 %v1268_v48  ;;  %v1274_v51 = vld [vmem:[%s1582_s0] sm:$0xff]   ;;  %v1246_v52 = vld [vmem:[%s1494_s6 + $0x10] ss:$8 sps:$4 sm:$0xff]   ;;  %v1250_v55 = vld [vmem:[%s1494_s6 + $0xf4] ss:$8 sps:$4 sm:$0xff]   ;;  %s519_s30 = scalar_lea.vmem %s1586_s4, %s1597_s24 }
  0x4a   : > { %749 = vmatpush1.bf16.msra.mxu0 %v1231_v39  ;;  %841 = vmatpush1.bf16.msra.mxu1 %v1270_v49  ;;  %v1247_v53 = vld [vmem:[%s1494_s6 + $0x4] ss:$8 sps:$4 sm:$0xff]   ;;  %v1249_v54 = vld [vmem:[%s1494_s6] ss:$8 sps:$4 sm:$0xff]   ;;  %v1252_v57 = vld [vmem:[%s1494_s6 + $0xf0] ss:$8 sps:$4 sm:$0xff]  }
  0x4b   : > { %750 = vmatprep.subr.bf16.mxu0 %v1232_v40  ;;  %v1281_v56 = vld [vmem:[%s1582_s0 + $0x8] sm:$0xff]   ;;  %v1256_v60 = vld [vmem:[%s1494_s6 + $0xd4] ss:$8 sps:$4 sm:$0xff]   ;;  %v1258_v61 = vld [vmem:[%s1494_s6 + $0xd0] ss:$8 sps:$4 sm:$0xff]   ;;  %v883_v16 = vsub.s32 0, %v882_v14 }
  0x4c   : > { %v1253_v58 = vld [vmem:[%s1494_s6 + $0xe4] ss:$8 sps:$4 sm:$0xff]   ;;  %v1255_v59 = vld [vmem:[%s1494_s6 + $0xe0] ss:$8 sps:$4 sm:$0xff]   ;;  %v1262_v0 = vld [vmem:[%s1494_s6 + $0xb4] ss:$8 sps:$4 sm:$0xff]  }
  0x4d   : > { %1167 = vmatmul.mubr.msk.bf16.vlgmr.msra.gmra.mxu1 %vm819_vm0, %v1274_v51  ;;  %v1259_v62 = vld [vmem:[%s1494_s6 + $0xc4] ss:$8 sps:$4 sm:$0xff]   ;;  %v1261_v63 = vld [vmem:[%s1494_s6 + $0xc0] ss:$8 sps:$4 sm:$0xff]   ;;  %v1264_v1 = vld [vmem:[%s1494_s6 + $0xb0] ss:$8 sps:$4 sm:$0xff]  }
  0x4e   : > { %751 = vmatpush1.bf16.msra.mxu0 %v1234_v41  ;;  %868 = vmatprep.mubr.bf16.mxu1 %v1325_v34  ;;  %v1265_v2 = vld [vmem:[%s1494_s6 + $0xa4] ss:$8 sps:$4 sm:$0xff]   ;;  %v1267_v3 = vld [vmem:[%s1494_s6 + $0xa0] ss:$8 sps:$4 sm:$0xff]   ;;  %v1271_v4 = vld [vmem:[%s1494_s6 + $0x94] ss:$8 sps:$4 sm:$0xff]  }
  0x4f   : > { %752 = vmatprep.subr.bf16.mxu0 %v1235_v42  ;;  %v1273_v5 = vld [vmem:[%s1494_s6 + $0x90] ss:$8 sps:$4 sm:$0xff]   ;;  %v1275_v6 = vld [vmem:[%s1494_s6 + $0x84] ss:$8 sps:$4 sm:$0xff]   ;;  %v1277_v7 = vld [vmem:[%s1494_s6 + $0x80] ss:$8 sps:$4 sm:$0xff]  }
  0x50   : > { %v1278_v8 = vld [vmem:[%s1583_s1] ss:$8 sps:$4 sm:$0xff]   ;;  %v1282_v9 = vld [vmem:[%s1583_s1 + $0x14] ss:$8 sps:$4 sm:$0xff]   ;;  %v1284_v10 = vld [vmem:[%s1583_s1 + $0x10] ss:$8 sps:$4 sm:$0xff]  }
  0x51   : > { %v887_v17 = vsub.s32 1, %v882_v14  ;;  %v879_v18 = vld [vmem:[%s519_s30] sm:$0x3]  ;;  %s1125_s6 = sshll.u32 %s1488_s25, 5  ;;  %s1184_s25 = sshll.u32 (%p1395_p6), %s1315_s20, 3 }
  0x52   : > { %753 = vmatpush1.bf16.msra.mxu0 %v1237_v43  ;;  %v884_v22 = vrot.slane %v879_v18, %v883_v16  ;;  %s1551_s18 = scalar_lea.vmem [#allocation4], %s1125_s6  ;;  %s939_s9 = scalar_lea.vmem (%p1395_p6), %s1587_s5, %s1184_s25 }
  0x53   : > { %754 = vmatprep.subr.bf16.mxu0 %v1238_v44  ;;  %v888_v23 = vrot.slane %v879_v18, %v887_v17 }
  0x55   : > { %1168 = vmatmul.mubr.msk.bf16.gmra.mxu1 %vm819_vm0, %v1281_v56 }
  0x56   : > { %755 = vmatpush1.bf16.msra.mxu0 %v1240_v45 }
  0x57   : > { %756 = vmatprep.subr.bf16.mxu0 %v1241_v46 }
  0x5a   : > { %757 = vmatpush1.bf16.msra.mxu0 %v1243_v47 }
  0x5b   : > { %758 = vmatprep.subr.bf16.mxu0 %v1244_v50 }
  0x5e   : > { %759 = vmatpush1.bf16.msra.mxu0 %v1246_v52 }
  0x5f   : > { %760 = vmatprep.subr.bf16.mxu0 %v1247_v53 }
  0x62   : > { %761 = vmatpush1.bf16.msra.mxu0 %v1249_v54 }
  0x63   : > { %762 = vmatprep.subr.bf16.mxu0 %v1250_v55 }
  0x66   : > { %763 = vmatpush2.bf16.msra.mxu0 %v1252_v57 }
  0x67   : > { %764 = vmatprep.subr.bf16.mxu0 %v1253_v58 }
  0x6a   : > { %765 = vmatpush2.bf16.msra.mxu0 %v1255_v59 }
  0x6b   : > { %766 = vmatprep.subr.bf16.mxu0 %v1256_v60 }
  0x6e   : > { %767 = vmatpush2.bf16.msra.mxu0 %v1258_v61 }
  0x6f   : > { %768 = vmatprep.subr.bf16.mxu0 %v1259_v62 }
  0x72   : > { %769 = vmatpush2.bf16.msra.mxu0 %v1261_v63 }
  0x73   : > { %770 = vmatprep.subr.bf16.mxu0 %v1262_v0 }
  0x76   : > { %771 = vmatpush2.bf16.msra.mxu0 %v1264_v1 }
  0x77   : > { %772 = vmatprep.subr.bf16.mxu0 %v1265_v2 }
  0x7a   : > { %773 = vmatpush2.bf16.msra.mxu0 %v1267_v3 }
  0x7b   : > { %774 = vmatprep.subr.bf16.mxu0 %v1271_v4 }
  0x7e   : > { %775 = vmatpush2.bf16.msra.mxu0 %v1273_v5 }
  0x7f   : > { %776 = vmatprep.subr.bf16.mxu0 %v1275_v6 }
  0x82   : > { %777 = vmatpush2.bf16.msra.mxu0 %v1277_v7 }
  0x85   : > { %779 = vmatmul.mubr.bf16.vlgmr.msra.gmra.mxu0 %v1278_v8 }
  0x86   : > { %788 = vmatprep.mubr.bf16.mxu0 %v1282_v9 }
  0x8d   : > { %789 = vmatmul.mubr.bf16.gmra.mxu0 %v1284_v10 }
 0x10d   : > { %v860_v11 = vpop.f32.mrf.mxu1 }
 0x10f   : > { %v862_v13 = vpop.f32.mrf.mxu1 }
 0x111   : > { %v864_v15 = vpop.f32.mrf.mxu1 }
 0x113   : > { %v866_v19 = vpop.f32.mrf.mxu1 }
 0x115   : > { %v870_v25 = vpop.f32.mrf.mxu1 }
 0x117   : > { %v872_v31 = vpop.f32.mrf.mxu1 }
 0x119   : > { %v874_v39 = vpop.f32.mrf.mxu1 }
 0x11b   : > { %v876_v47 = vpop.f32.mrf.mxu1 }
 0x145   : > { %v780_v20 = vpop.f32.mrf.mxu0 }
 0x146   : > { %v861_v21 = vadd.f32 %v860_v11, %v780_v20 }
 0x147   : > { %v782_v24 = vpop.f32.mrf.mxu0 }
 0x148   : > { %v863_v26 = vadd.f32 %v862_v13, %v782_v24  ;;  %v891_v28 = vadd.f32 %v884_v22, %v861_v21 }
 0x149   : > { %v784_v27 = vpop.f32.mrf.mxu0 }
 0x14a   : > { %v892_v29 = vadd.f32 %v888_v23, %v863_v26  ;;  %v865_v30 = vadd.f32 %v864_v15, %v784_v27 }
 0x14b   : > { %v786_v32 = vpop.f32.mrf.mxu0 }
 0x14c   : > { %v1180_v33 = vpack.c.bf16 %v892_v29, %v891_v28  ;;  %v867_v34 = vadd.f32 %v866_v19, %v786_v32  ;;  %v893_v36 = vadd.f32 %v884_v22, %v865_v30 }
 0x14d   : > { %v790_v35 = vpop.f32.mrf.mxu0 }
 0x14e   : > { %923 = vst [vmem:[%s1551_s18] sm:$0xff] %v1180_v33  ;;  %v894_v37 = vadd.f32 %v888_v23, %v867_v34  ;;  %v871_v38 = vadd.f32 %v870_v25, %v790_v35 }
 0x14f   : > { %v792_v40 = vpop.f32.mrf.mxu0 }
 0x150   : > { %v1181_v41 = vpack.c.bf16 %v894_v37, %v893_v36  ;;  %v873_v42 = vadd.f32 %v872_v31, %v792_v40  ;;  %v895_v44 = vadd.f32 %v884_v22, %v871_v38 }
 0x151   : > { %v794_v43 = vpop.f32.mrf.mxu0 }
 0x152   : > { %924 = vst [vmem:[%s1551_s18 + $0x8] sm:$0xff] %v1181_v41  ;;  %v896_v45 = vadd.f32 %v888_v23, %v873_v42  ;;  %v875_v46 = vadd.f32 %v874_v39, %v794_v43 }
 0x153   : > { %v796_v48 = vpop.f32.mrf.mxu0 }
 0x154   : > { %v1182_v49 = vpack.c.bf16 %v896_v45, %v895_v44  ;;  %v877_v50 = vadd.f32 %v876_v47, %v796_v48  ;;  %v897_v51 = vadd.f32 %v884_v22, %v875_v46 }
 0x155   : > { %v974_v54 = vld [vmem:[%s1551_s18] sm:$0xff] (%p1395_p6) }
 0x156   : > { %925 = vst [vmem:[%s1551_s18 + $0x10] sm:$0xff] %v1182_v49  ;;  %v898_v52 = vadd.f32 %v888_v23, %v877_v50  ;;  %933 = sbr.rel (!%p1395_p6) target bundleno = 355 (0x163), region = 120  ;;  %975 = vst [vmem:[%s939_s9] sm:$0xff] (%p1395_p6), %v974_v54 }
 0x158   : > { %v1183_v53 = vpack.c.bf16 %v898_v52, %v897_v51 }
 0x159   : > { %v976_v55 = vld [vmem:[%s1551_s18 + $0x8] sm:$0xff] (%p1395_p6) }
 0x15a   : > { %926 = vst [vmem:[%s1551_s18 + $0x18] sm:$0xff] %v1183_v53  ;;  %977 = vst [vmem:[%s939_s9 + $0x20] sm:$0xff] (%p1395_p6), %v976_v55 }
 0x15d   : > { %v978_v56 = vld [vmem:[%s1551_s18 + $0x10] sm:$0xff] }
 0x15e   : > { %979 = vst [vmem:[%s939_s9 + $0x40] sm:$0xff] %v978_v56 }
 0x161   : > { %v980_v57 = vld [vmem:[%s1551_s18 + $0x18] sm:$0xff] }
 0x162   : > { %981 = vst [vmem:[%s939_s9 + $0x60] sm:$0xff] %v980_v57 }
 0x163 PF: > { %s15_s22 = sadd.s32 1, %s1323_s22   ;;  %s1590_s18 = smov %s1311_s19 }
 0x164   : > { %p12_p12 = scmp.ge.s32.totalorder %s15_s22, 6   ;;  %s1591_s19 = smov %s1400_s29 }
 0x165   : > { %s1592_s20 = smov %s1319_s21  ;;  %s1593_s21 = smov %s1595_s23 }
 0x166   :  { %14 = sbr.rel (!%p12_p12) target bundleno = 3 (0x3), region = 206 }

// kernel: flowformer_forward.11
= control target key start
LH: loop header
LB: loop body
LE: loop exit
PB: predicated region body
PF: predicated region fallthrough
CT: control target
= control target key end

     0   :  { %v204_v40 = vlaneseq  ;;  %v940_v56 = vmov 1983009808   ;;  %vm272_vm0 = vcmask 1041409   ;;  %vm274_vm1 = vcmask 1043459   ;;  %s1438_s0 = inlined_call_operand.vmem [shape: bf16[2,16,1024], index: 0, kind: input, shape index: {}]   ;;  %s1439_s1 = inlined_call_operand.vmem [shape: f32[1024,2], index: 1, kind: input, shape index: {}]   ;;  %s1440_s2 = inlined_call_operand.vmem [shape: f32[1,2], index: 2, kind: input, shape index: {}]   ;;  %s1441_s3 = inlined_call_operand.hbm [shape: f32[2,2], index: 3, kind: output, shape index: {}]  }
   0x1   :  { %v331_v0 = vld [vmem:[%s1439_s1 + $0xf8] sm:$0xff]  ;;  %v330_v2 = vld [vmem:[%s1439_s1 + $0xf0] sm:$0xff]  ;;  %v329_v6 = vld [vmem:[%s1439_s1 + $0xe8] sm:$0xff]  ;;  %v1121_v57 = vunpack.c.l.s4 %v940_v56  ;;  %vm276_vm2 = vcmask 1045509   ;;  %vm278_vm3 = vcmask 1047559  }
   0x2   :  { %v315_v1 = vld [vmem:[%s1439_s1 + $0x78] sm:$0xff]  ;;  %776 = vmatprep.subr.mxu0 %v331_v0  ;;  %v314_v4 = vld [vmem:[%s1439_s1 + $0x70] sm:$0xff]  ;;  %v313_v8 = vld [vmem:[%s1439_s1 + $0x68] sm:$0xff]  ;;  %v1123_v58 = vshrl.u32 %v204_v40, 7 }
   0x3   :  { %v363_v3 = vld [vmem:[%s1439_s1 + $0x1f8] sm:$0xff]  ;;  %777 = vmatpush3.msra.mxu0 %v315_v1  ;;  %v362_v7 = vld [vmem:[%s1439_s1 + $0x1f0] sm:$0xff]  ;;  %v361_v10 = vld [vmem:[%s1439_s1 + $0x1e8] sm:$0xff] }
   0x4   :  { %v347_v5 = vld [vmem:[%s1439_s1 + $0x178] sm:$0xff]  ;;  %811 = vmatprep.subr.mxu1 %v363_v3  ;;  %778 = vmatprep.subr.mxu0 %v330_v2  ;;  %v346_v9 = vld [vmem:[%s1439_s1 + $0x170] sm:$0xff]  ;;  %v328_v11 = vld [vmem:[%s1439_s1 + $0xe0] sm:$0xff] }
   0x5   :  { %812 = vmatpush3.msra.mxu1 %v347_v5  ;;  %779 = vmatpush3.msra.mxu0 %v314_v4  ;;  %v345_v12 = vld [vmem:[%s1439_s1 + $0x168] sm:$0xff]  ;;  %v312_v13 = vld [vmem:[%s1439_s1 + $0x60] sm:$0xff]  ;;  %v327_v15 = vld [vmem:[%s1439_s1 + $0xd8] sm:$0xff] }
   0x6   :  { %813 = vmatprep.subr.mxu1 %v362_v7  ;;  %780 = vmatprep.subr.mxu0 %v329_v6  ;;  %v360_v14 = vld [vmem:[%s1439_s1 + $0x1e0] sm:$0xff]  ;;  %v311_v17 = vld [vmem:[%s1439_s1 + $0x58] sm:$0xff]  ;;  %v326_v19 = vld [vmem:[%s1439_s1 + $0xd0] sm:$0xff] }
   0x7   :  { %814 = vmatpush3.msra.mxu1 %v346_v9  ;;  %781 = vmatpush3.msra.mxu0 %v313_v8  ;;  %v344_v16 = vld [vmem:[%s1439_s1 + $0x160] sm:$0xff]  ;;  %v359_v18 = vld [vmem:[%s1439_s1 + $0x1d8] sm:$0xff]  ;;  %v310_v21 = vld [vmem:[%s1439_s1 + $0x50] sm:$0xff] }
   0x8   :  { %815 = vmatprep.subr.mxu1 %v361_v10  ;;  %782 = vmatprep.subr.mxu0 %v328_v11  ;;  %v343_v20 = vld [vmem:[%s1439_s1 + $0x158] sm:$0xff]  ;;  %v358_v22 = vld [vmem:[%s1439_s1 + $0x1d0] sm:$0xff]  ;;  %v325_v23 = vld [vmem:[%s1439_s1 + $0xc8] sm:$0xff] }
   0x9   :  { %816 = vmatpush3.msra.mxu1 %v345_v12  ;;  %783 = vmatpush3.msra.mxu0 %v312_v13  ;;  %v342_v24 = vld [vmem:[%s1439_s1 + $0x150] sm:$0xff]  ;;  %v309_v25 = vld [vmem:[%s1439_s1 + $0x48] sm:$0xff]  ;;  %v324_v27 = vld [vmem:[%s1439_s1 + $0xc0] sm:$0xff] }
   0xa   :  { %817 = vmatprep.subr.mxu1 %v360_v14  ;;  %784 = vmatprep.subr.mxu0 %v327_v15  ;;  %v357_v26 = vld [vmem:[%s1439_s1 + $0x1c8] sm:$0xff]  ;;  %v308_v29 = vld [vmem:[%s1439_s1 + $0x40] sm:$0xff]  ;;  %v323_v31 = vld [vmem:[%s1439_s1 + $0xb8] sm:$0xff] }
   0xb   :  { %818 = vmatpush3.msra.mxu1 %v344_v16  ;;  %785 = vmatpush3.msra.mxu0 %v311_v17  ;;  %v341_v28 = vld [vmem:[%s1439_s1 + $0x148] sm:$0xff]  ;;  %v356_v30 = vld [vmem:[%s1439_s1 + $0x1c0] sm:$0xff]  ;;  %v307_v33 = vld [vmem:[%s1439_s1 + $0x38] sm:$0xff] }
   0xc   :  { %819 = vmatprep.subr.mxu1 %v359_v18  ;;  %786 = vmatprep.subr.mxu0 %v326_v19  ;;  %v340_v32 = vld [vmem:[%s1439_s1 + $0x140] sm:$0xff]  ;;  %v355_v34 = vld [vmem:[%s1439_s1 + $0x1b8] sm:$0xff]  ;;  %v322_v35 = vld [vmem:[%s1439_s1 + $0xb0] sm:$0xff] }
   0xd   :  { %820 = vmatpush3.msra.mxu1 %v343_v20  ;;  %787 = vmatpush3.msra.mxu0 %v310_v21  ;;  %v339_v36 = vld [vmem:[%s1439_s1 + $0x138] sm:$0xff]  ;;  %v306_v37 = vld [vmem:[%s1439_s1 + $0x30] sm:$0xff]  ;;  %v321_v38 = vld [vmem:[%s1439_s1 + $0xa8] sm:$0xff] }
   0xe   :  { %821 = vmatprep.subr.mxu1 %v358_v22  ;;  %788 = vmatprep.subr.mxu0 %v325_v23  ;;  %v354_v39 = vld [vmem:[%s1439_s1 + $0x1b0] sm:$0xff]  ;;  %v305_v41 = vld [vmem:[%s1439_s1 + $0x28] sm:$0xff]  ;;  %v320_v43 = vld [vmem:[%s1439_s1 + $0xa0] sm:$0xff] }
   0xf   :  { %822 = vmatpush3.msra.mxu1 %v342_v24  ;;  %789 = vmatpush3.msra.mxu0 %v309_v25  ;;  %v338_v42 = vld [vmem:[%s1439_s1 + $0x130] sm:$0xff]  ;;  %v353_v44 = vld [vmem:[%s1439_s1 + $0x1a8] sm:$0xff]  ;;  %v304_v45 = vld [vmem:[%s1439_s1 + $0x20] sm:$0xff] }
  0x10   :  { %823 = vmatprep.subr.mxu1 %v357_v26  ;;  %790 = vmatprep.subr.mxu0 %v324_v27  ;;  %v337_v46 = vld [vmem:[%s1439_s1 + $0x128] sm:$0xff]  ;;  %v319_v47 = vld [vmem:[%s1439_s1 + $0x98] sm:$0xff]  ;;  %v352_v48 = vld [vmem:[%s1439_s1 + $0x1a0] sm:$0xff]  ;;  %v203_v26 = vunpack.c.0.s8 %v1121_v57 }
  0x11   :  { %824 = vmatpush3.msra.mxu1 %v341_v28  ;;  %791 = vmatpush3.msra.mxu0 %v308_v29  ;;  %v336_v49 = vld [vmem:[%s1439_s1 + $0x120] sm:$0xff]  ;;  %v24_v51 = vld [vmem:[%s1438_s0 + $0x8] sm:$0xff]  ;;  %v303_v2 = vld [vmem:[%s1439_s1 + $0x18] sm:$0xff] }
  0x12   :  { %825 = vmatprep.subr.mxu1 %v356_v30  ;;  %792 = vmatprep.subr.mxu0 %v323_v31  ;;  %v23_v50 = vld [vmem:[%s1438_s0] sm:$0xff]  ;;  %v28_v53 = vld [vmem:[%s1438_s0 + $0x28] sm:$0xff]  ;;  %v41_v62 = vunpack.c.l.bf16 %v24_v51  ;;  %v42_v63 = vunpack.c.h.bf16 %v24_v51  ;;  %v351_v3 = vld [vmem:[%s1439_s1 + $0x198] sm:$0xff] }
  0x13   :  { %826 = vmatpush3.msra.mxu1 %v340_v32  ;;  %793 = vmatpush3.msra.mxu0 %v307_v33  ;;  %v27_v52 = vld [vmem:[%s1438_s0 + $0x20] sm:$0xff]  ;;  %v39_v54 = vunpack.c.l.bf16 %v23_v50  ;;  %v40_v55 = vunpack.c.h.bf16 %v23_v50  ;;  %v32_v60 = vld [vmem:[%s1438_s0 + $0x48] sm:$0xff]  ;;  %v49_v5 = vunpack.c.l.bf16 %v28_v53  ;;  %v50_v6 = vunpack.c.h.bf16 %v28_v53  ;;  %v318_v9 = vld [vmem:[%s1439_s1 + $0x90] sm:$0xff] }
  0x14   :  { %827 = vmatprep.subr.mxu1 %v355_v34  ;;  %794 = vmatprep.subr.mxu0 %v322_v35  ;;  %v31_v59 = vld [vmem:[%s1438_s0 + $0x40] sm:$0xff]  ;;  %v47_v0 = vunpack.c.l.bf16 %v27_v52  ;;  %v48_v1 = vunpack.c.h.bf16 %v27_v52  ;;  %v36_v4 = vld [vmem:[%s1438_s0 + $0x68] sm:$0xff]  ;;  %v335_v10 = vld [vmem:[%s1439_s1 + $0x118] sm:$0xff]  ;;  %v57_v11 = vunpack.c.l.bf16 %v32_v60  ;;  %v58_v12 = vunpack.c.h.bf16 %v32_v60 }
  0x15   :  { %828 = vmatpush3.msra.mxu1 %v339_v36  ;;  %795 = vmatpush3.msra.mxu0 %v306_v37  ;;  %v35_v61 = vld [vmem:[%s1438_s0 + $0x60] sm:$0xff]  ;;  %v55_v7 = vunpack.c.l.bf16 %v31_v59  ;;  %v56_v8 = vunpack.c.h.bf16 %v31_v59  ;;  %v302_v15 = vld [vmem:[%s1439_s1 + $0x10] sm:$0xff]  ;;  %v65_v17 = vunpack.c.l.bf16 %v36_v4  ;;  %v66_v18 = vunpack.c.h.bf16 %v36_v4  ;;  %v317_v21 = vld [vmem:[%s1439_s1 + $0x88] sm:$0xff] }
  0x16   :  { %829 = vmatprep.subr.mxu1 %v354_v39  ;;  %796 = vmatprep.subr.mxu0 %v321_v38  ;;  %v63_v13 = vunpack.c.l.bf16 %v35_v61  ;;  %v64_v14 = vunpack.c.h.bf16 %v35_v61  ;;  %v350_v16 = vld [vmem:[%s1439_s1 + $0x190] sm:$0xff]  ;;  %v71_v19 = vadd.f32 %v47_v0, %v39_v54  ;;  %v78_v20 = vadd.f32 %v48_v1, %v40_v55  ;;  %v301_v27 = vld [vmem:[%s1439_s1 + $0x8] sm:$0xff]  ;;  %v316_v33 = vld [vmem:[%s1439_s1 + $0x80] sm:$0xff] }
  0x17   :  { %830 = vmatpush3.msra.mxu1 %v338_v42  ;;  %797 = vmatpush3.msra.mxu0 %v305_v41  ;;  %v334_v22 = vld [vmem:[%s1439_s1 + $0x110] sm:$0xff]  ;;  %v85_v23 = vadd.f32 %v49_v5, %v41_v62  ;;  %v92_v24 = vadd.f32 %v50_v6, %v42_v63  ;;  %v349_v28 = vld [vmem:[%s1439_s1 + $0x188] sm:$0xff]  ;;  %v141_v32 = vadd.f32 %v65_v17, %v57_v11  ;;  %v300_v39 = vld [vmem:[%s1439_s1] sm:$0xff] }
  0x18   :  { %831 = vmatprep.subr.mxu1 %v353_v44  ;;  %798 = vmatprep.subr.mxu0 %v320_v43  ;;  %v127_v25 = vadd.f32 %v63_v13, %v55_v7  ;;  %v72_v29 = vrot.slane %v71_v19, 4  ;;  %v79_v30 = vrot.slane %v78_v20, 4  ;;  %v134_v31 = vadd.f32 %v64_v14, %v56_v8  ;;  %v333_v34 = vld [vmem:[%s1439_s1 + $0x108] sm:$0xff]  ;;  %v348_v44 = vld [vmem:[%s1439_s1 + $0x180] sm:$0xff]  ;;  %v427_v55 = vld [vmem:[%s1439_s1 + $0x3f8] sm:$0xff] }
  0x19   :  { %832 = vmatpush3.msra.mxu1 %v337_v46  ;;  %799 = vmatpush3.msra.mxu0 %v304_v45  ;;  %v86_v35 = vrot.slane %v85_v23, 4  ;;  %v93_v36 = vrot.slane %v92_v24, 4  ;;  %v148_v38 = vadd.f32 %v66_v18, %v58_v12  ;;  %v142_v43 = vrot.slane %v141_v32, 4  ;;  %v332_v50 = vld [vmem:[%s1439_s1 + $0x100] sm:$0xff]  ;;  %v25_v57 = vld [vmem:[%s1438_s0 + $0x10] sm:$0xff] }
  0x1a   :  { %833 = vmatprep.subr.mxu1 %v352_v48  ;;  %800 = vmatprep.subr.mxu0 %v319_v47  ;;  %v128_v37 = vrot.slane %v127_v25, 4  ;;  %v73_v40 = vadd.f32 %v72_v29, %v71_v19  ;;  %v80_v41 = vadd.f32 %v79_v30, %v78_v20  ;;  %v135_v42 = vrot.slane %v134_v31, 4 }
  0x1b   :  { %834 = vmatpush3.msra.mxu1 %v336_v49  ;;  %801 = vmatpush3.msra.mxu0 %v303_v2  ;;  %v87_v45 = vadd.f32 %v86_v35, %v85_v23  ;;  %v94_v46 = vadd.f32 %v93_v36, %v92_v24  ;;  %v149_v48 = vrot.slane %v148_v38, 4  ;;  %v395_v49 = vld [vmem:[%s1439_s1 + $0x2f8] sm:$0xff]  ;;  %v143_v54 = vadd.f32 %v142_v43, %v141_v32 }
  0x1c   :  { %835 = vmatprep.subr.mxu1 %v351_v3  ;;  %802 = vmatprep.subr.mxu0 %v318_v9  ;;  %v129_v47 = vadd.f32 %v128_v37, %v127_v25  ;;  %v74_v51 = vrot.slane %v73_v40, 2  ;;  %v81_v52 = vrot.slane %v80_v41, 2  ;;  %v136_v53 = vadd.f32 %v135_v42, %v134_v31  ;;  %v30_v36 = vld [vmem:[%s1438_s0 + $0x38] sm:$0xff]  ;;  %v33_v37 = vld [vmem:[%s1438_s0 + $0x50] sm:$0xff] }
  0x1d   :  { %836 = vmatpush3.msra.mxu1 %v335_v10  ;;  %803 = vmatpush3.msra.mxu0 %v302_v15  ;;  %v88_v56 = vrot.slane %v87_v45, 2  ;;  %v95_v59 = vrot.slane %v94_v46, 2  ;;  %v150_v61 = vadd.f32 %v149_v48, %v148_v38  ;;  %v144_v1 = vrot.slane %v143_v54, 2  ;;  %v1216_v43 = vld [vmem:[%s1438_s0 + $0x58] sm:$0xff] }
  0x1e   :  { %837 = vmatprep.subr.mxu1 %v350_v16  ;;  %804 = vmatprep.subr.mxu0 %v317_v21  ;;  %v130_v60 = vrot.slane %v129_v47, 2  ;;  %v75_v62 = vadd.f32 %v74_v51, %v73_v40  ;;  %v82_v63 = vadd.f32 %v81_v52, %v80_v41  ;;  %v137_v0 = vrot.slane %v136_v53, 2 }
  0x1f   :  { %838 = vmatpush3.msra.mxu1 %v334_v22  ;;  %805 = vmatpush3.msra.mxu0 %v301_v27  ;;  %v89_v2 = vadd.f32 %v88_v56, %v87_v45  ;;  %v96_v3 = vadd.f32 %v95_v59, %v94_v46  ;;  %v151_v5 = vrot.slane %v150_v61, 2  ;;  %v145_v9 = vadd.f32 %v144_v1, %v143_v54  ;;  %v1224_v45 = vld [vmem:[%s1438_s0 + $0x78] sm:$0xff] }
  0x20   :  { %839 = vmatprep.subr.mxu1 %v349_v28  ;;  %806 = vmatprep.subr.mxu0 %v316_v33  ;;  %v131_v4 = vadd.f32 %v130_v60, %v129_v47  ;;  %v76_v6 = vrot.slane %v75_v62, 1  ;;  %v83_v7 = vrot.slane %v82_v63, 1  ;;  %v138_v8 = vadd.f32 %v137_v0, %v136_v53 }
  0x21   :  { %840 = vmatpush3.msra.mxu1 %v333_v34  ;;  %807 = vmatpush3.msra.mxu0 %v300_v39  ;;  %v90_v10 = vrot.slane %v89_v2, 1  ;;  %v97_v11 = vrot.slane %v96_v3, 1  ;;  %v152_v13 = vadd.f32 %v151_v5, %v150_v61  ;;  %v146_v17 = vrot.slane %v145_v9, 1 }
  0x22   :  { %841 = vmatprep.subr.mxu1 %v348_v44  ;;  %846 = vmatprep.subr.mxu0 %v395_v49  ;;  %v132_v12 = vrot.slane %v131_v4, 1  ;;  %v77_v14 = vadd.f32 %v76_v6, %v75_v62  ;;  %v84_v15 = vadd.f32 %v83_v7, %v82_v63  ;;  %v139_v16 = vrot.slane %v138_v8, 1  ;;  %v37_v44 = vld [vmem:[%s1438_s0 + $0x70] sm:$0xff] }
  0x23   :  { %842 = vmatpush3.msra.mxu1 %v332_v50  ;;  %v91_v18 = vadd.f32 %v90_v10, %v89_v2  ;;  %v98_v19 = vadd.f32 %v97_v11, %v96_v3  ;;  %v153_v21 = vrot.slane %v152_v13, 1  ;;  %v147_v23 = vadd.f32 %v146_v17, %v145_v9 }
  0x24   :  { %881 = vmatprep.subr.mxu1 %v427_v55  ;;  %v133_v20 = vadd.f32 %v132_v12, %v131_v4  ;;  %v140_v22 = vadd.f32 %v139_v16, %v138_v8  ;;  %v199_v24 = vcombine.low %v77_v14, %v84_v15  ;;  %v1192_v25 = vsub.s32 %v203_v26, %v1123_v58  ;;  %v26_v58 = vld [vmem:[%s1438_s0 + $0x18] sm:$0xff]  ;;  %v29_v26 = vld [vmem:[%s1438_s0 + $0x30] sm:$0xff] }
  0x25   :  { %v154_v27 = vadd.f32 %v153_v21, %v152_v13  ;;  %v200_v28 = vcombine.low %v91_v18, %v98_v19  ;;  %v43_v38 = vunpack.c.l.bf16 %v25_v57  ;;  %v44_v39 = vunpack.c.h.bf16 %v25_v57 }
  0x26   :  { %v207_v29 = vrot.slane %v199_v24, %v1192_v25  ;;  %v233_v30 = vcombine.low %v133_v20, %v140_v22  ;;  %v45_v40 = vunpack.c.l.bf16 %v26_v58  ;;  %v46_v41 = vunpack.c.h.bf16 %v26_v58 }
  0x27   :  { %v214_v31 = vrot.slane %v200_v28, %v1192_v25  ;;  %v234_v32 = vcombine.low %v147_v23, %v154_v27  ;;  %v51_v46 = vunpack.c.l.bf16 %v29_v26  ;;  %v52_v47 = vunpack.c.h.bf16 %v29_v26 }
  0x28   :  { %v241_v33 = vrot.slane %v233_v30, %v1192_v25  ;;  %v53_v48 = vunpack.c.l.bf16 %v30_v36  ;;  %v54_v49 = vunpack.c.h.bf16 %v30_v36  ;;  %v59_v50 = vunpack.c.l.bf16 %v33_v37 }
  0x29   :  { %v215_v34 = vcombine.low %v207_v29, %v214_v31  ;;  %v248_v35 = vrot.slane %v234_v32, %v1192_v25  ;;  %v60_v51 = vunpack.c.h.bf16 %v33_v37  ;;  %v67_v53 = vunpack.c.l.bf16 %v37_v44 }
  0x2a   :  { %v68_v54 = vunpack.c.h.bf16 %v37_v44 }
  0x2b   :  { %v249_v42 = vcombine.low %v241_v33, %v248_v35 }
  0x2d   :  { %v271_v52 = vrot.slane %v249_v42, 7 }
  0x2e   :  { %8 = vsyncpa [#allocation4], 0  ;;  %v61_v55 = vunpack.c.l.bf16 %v1216_v43  ;;  %v69_v56 = vunpack.c.l.bf16 %v1224_v45  ;;  %v99_v59 = vadd.f32 %v51_v46, %v43_v38  ;;  %v106_v60 = vadd.f32 %v52_v47, %v44_v39  ;;  %v379_v31 = vld [vmem:[%s1439_s1 + $0x278] sm:$0xff]  ;;  %v394_v58 = vld [vmem:[%s1439_s1 + $0x2f0] sm:$0xff] }
  0x2f   :  { %v273_v61 = vsel %vm272_vm0, %v271_v52, %v215_v34  ;;  %v113_v62 = vadd.f32 %v53_v48, %v45_v40  ;;  %v120_v63 = vadd.f32 %v54_v49, %v46_v41  ;;  %v155_v0 = vadd.f32 %v67_v53, %v59_v50  ;;  %v378_v38 = vld [vmem:[%s1439_s1 + $0x270] sm:$0xff]  ;;  %v411_v39 = vld [vmem:[%s1439_s1 + $0x378] sm:$0xff]  ;;  %v393_v42 = vld [vmem:[%s1439_s1 + $0x2e8] sm:$0xff] }
  0x30   :  { %v275_v1 = vsel %vm274_vm1, %v271_v52, %v273_v61  ;;  %v100_v2 = vrot.slane %v99_v59, 4  ;;  %v107_v3 = vrot.slane %v106_v60, 4  ;;  %v162_v4 = vadd.f32 %v68_v54, %v60_v51  ;;  %v410_v46 = vld [vmem:[%s1439_s1 + $0x370] sm:$0xff]  ;;  %v392_v49 = vld [vmem:[%s1439_s1 + $0x2e0] sm:$0xff]  ;;  %v425_v50 = vld [vmem:[%s1439_s1 + $0x3e8] sm:$0xff] }
  0x31   :  { %v277_v5 = vsel %vm276_vm2, %v271_v52, %v275_v1  ;;  %v114_v6 = vrot.slane %v113_v62, 4  ;;  %v121_v7 = vrot.slane %v120_v63, 4  ;;  %v156_v8 = vrot.slane %v155_v0, 4  ;;  %v375_v1 = vld [vmem:[%s1439_s1 + $0x258] sm:$0xff] }
  0x32   :  { %v279_v9 = vsel %vm278_vm3, %v271_v52, %v277_v5  ;;  %v101_v10 = vadd.f32 %v100_v2, %v99_v59  ;;  %v108_v11 = vadd.f32 %v107_v3, %v106_v60  ;;  %v163_v12 = vrot.slane %v162_v4, 4  ;;  %v408_v2 = vld [vmem:[%s1439_s1 + $0x360] sm:$0xff]  ;;  %v390_v5 = vld [vmem:[%s1439_s1 + $0x2d0] sm:$0xff] }
  0x33   :  { %v298_v13 = vmul.f32 0.0625, %v279_v9  ;;  %v115_v14 = vadd.f32 %v114_v6, %v113_v62  ;;  %v122_v15 = vadd.f32 %v121_v7, %v120_v63  ;;  %v157_v16 = vadd.f32 %v156_v8, %v155_v0  ;;  %v391_v62 = vld [vmem:[%s1439_s1 + $0x2d8] sm:$0xff]  ;;  %v424_v63 = vld [vmem:[%s1439_s1 + $0x3e0] sm:$0xff] }
  0x34   :  { %v102_v17 = vrot.slane %v101_v10, 2  ;;  %v109_v18 = vrot.slane %v108_v11, 2  ;;  %v164_v19 = vadd.f32 %v163_v12, %v162_v4  ;;  %v169_v20 = vadd.f32 %v69_v56, %v61_v55  ;;  %v376_v55 = vld [vmem:[%s1439_s1 + $0x260] sm:$0xff]  ;;  %v409_v56 = vld [vmem:[%s1439_s1 + $0x368] sm:$0xff]  ;;  %v423_v6 = vld [vmem:[%s1439_s1 + $0x3d8] sm:$0xff] }
  0x35   :  { %v444_v21 = vrot.slane %v298_v13, %v1192_v25  ;;  %v437_v22 = vcombine.high %v298_v13, %v298_v13  ;;  %v116_v23 = vrot.slane %v115_v14, 2  ;;  %v123_v24 = vrot.slane %v122_v15, 2 }
  0x36   :  { %v158_v27 = vrot.slane %v157_v16, 2  ;;  %v165_v28 = vrot.slane %v164_v19, 2  ;;  %v62_v32 = vunpack.c.h.bf16 %v1216_v43  ;;  %v70_v33 = vunpack.c.h.bf16 %v1224_v45  ;;  %v426_v43 = vld [vmem:[%s1439_s1 + $0x3f0] sm:$0xff]  ;;  %v377_v45 = vld [vmem:[%s1439_s1 + $0x268] sm:$0xff] }
  0x37   :  { %v452_v29 = vcombine.high %v444_v21, %v444_v21  ;;  %v451_v30 = vrot.slane %v437_v22, %v1192_v25  ;;  %v103_v34 = vadd.f32 %v102_v17, %v101_v10  ;;  %v110_v35 = vadd.f32 %v109_v18, %v108_v11  ;;  %v374_v10 = vld [vmem:[%s1439_s1 + $0x250] sm:$0xff]  ;;  %v407_v11 = vld [vmem:[%s1439_s1 + $0x358] sm:$0xff]  ;;  %v373_v18 = vld [vmem:[%s1439_s1 + $0x248] sm:$0xff] }
  0x38   :  { %v117_v26 = vadd.f32 %v116_v23, %v115_v14  ;;  %v124_v36 = vadd.f32 %v123_v24, %v122_v15  ;;  %v170_v37 = vrot.slane %v169_v20, 4  ;;  %v159_v40 = vadd.f32 %v158_v27, %v157_v16  ;;  %v389_v16 = vld [vmem:[%s1439_s1 + $0x2c8] sm:$0xff]  ;;  %v422_v17 = vld [vmem:[%s1439_s1 + $0x3d0] sm:$0xff]  ;;  %v372_v24 = vld [vmem:[%s1439_s1 + $0x240] sm:$0xff] }
  0x39   :  { %543 = vmatprep.mubr.f32.mxu0 %v452_v29  ;;  %v453_v57 = vcombine.high %v451_v30, %v451_v30  ;;  %v166_v41 = vadd.f32 %v165_v28, %v164_v19  ;;  %v104_v47 = vrot.slane %v103_v34, 1  ;;  %v176_v48 = vadd.f32 %v70_v33, %v62_v32  ;;  %v406_v19 = vld [vmem:[%s1439_s1 + $0x350] sm:$0xff]  ;;  %v421_v22 = vld [vmem:[%s1439_s1 + $0x3c8] sm:$0xff]  ;;  %v387_v32 = vld [vmem:[%s1439_s1 + $0x2b8] sm:$0xff] }
  0x3a   :  { %544 = vmatmul.mubr.f32.vlgmr.msra.gmra.mxu0 %v444_v21  ;;  %v171_v44 = vadd.f32 %v170_v37, %v169_v20  ;;  %v111_v51 = vrot.slane %v110_v35, 1  ;;  %v118_v52 = vrot.slane %v117_v26, 1  ;;  %v125_v53 = vrot.slane %v124_v36, 1  ;;  %v388_v21 = vld [vmem:[%s1439_s1 + $0x2c0] sm:$0xff]  ;;  %v405_v27 = vld [vmem:[%s1439_s1 + $0x348] sm:$0xff]  ;;  %v370_v37 = vld [vmem:[%s1439_s1 + $0x230] sm:$0xff] }
  0x3b   :  { %847 = vmatpush3.msra.mxu0 %v379_v31  ;;  %613 = vmatprep.mubr.f32.mxu1 %v453_v57  ;;  %v160_v59 = vrot.slane %v159_v40, 1  ;;  %v167_v60 = vrot.slane %v166_v41, 1  ;;  %v177_v61 = vrot.slane %v176_v48, 4  ;;  %v105_v3 = vadd.f32 %v104_v47, %v103_v34  ;;  %v420_v33 = vld [vmem:[%s1439_s1 + $0x3c0] sm:$0xff]  ;;  %v371_v34 = vld [vmem:[%s1439_s1 + $0x238] sm:$0xff] }
  0x3c   :  { %848 = vmatprep.subr.mxu0 %v394_v58  ;;  %614 = vmatmul.mubr.f32.vlgmr.msra.gmra.mxu1 %v451_v30  ;;  %v172_v54 = vrot.slane %v171_v44, 2  ;;  %v112_v7 = vadd.f32 %v111_v51, %v110_v35  ;;  %v119_v8 = vadd.f32 %v118_v52, %v117_v26  ;;  %v126_v9 = vadd.f32 %v125_v53, %v124_v36  ;;  %v404_v35 = vld [vmem:[%s1439_s1 + $0x340] sm:$0xff]  ;;  %v386_v58 = vld [vmem:[%s1439_s1 + $0x2b0] sm:$0xff]  ;;  %v419_v26 = vld [vmem:[%s1439_s1 + $0x3b8] sm:$0xff] }
  0x3d   :  { %849 = vmatpush3.msra.mxu0 %v378_v38  ;;  %882 = vmatpush3.msra.mxu1 %v411_v39  ;;  %v178_v4 = vadd.f32 %v177_v61, %v176_v48  ;;  %v161_v12 = vadd.f32 %v160_v59, %v159_v40  ;;  %v168_v13 = vadd.f32 %v167_v60, %v166_v41  ;;  %v403_v38 = vld [vmem:[%s1439_s1 + $0x338] sm:$0xff]  ;;  %v384_v47 = vld [vmem:[%s1439_s1 + $0x2a0] sm:$0xff]  ;;  %v417_v48 = vld [vmem:[%s1439_s1 + $0x3a8] sm:$0xff]  ;;  %vm759_vm4 = vcmask 9216  }
  0x3e   :  { %850 = vmatprep.subr.mxu0 %v393_v42  ;;  %883 = vmatprep.subr.mxu1 %v426_v43  ;;  %v173_v0 = vadd.f32 %v172_v54, %v171_v44  ;;  %v216_v23 = vcombine.low %v105_v3, %v112_v7  ;;  %v217_v30 = vcombine.low %v119_v8, %v126_v9  ;;  %v385_v42 = vld [vmem:[%s1439_s1 + $0x2a8] sm:$0xff]  ;;  %v418_v43 = vld [vmem:[%s1439_s1 + $0x3b0] sm:$0xff]  ;;  %v383_v53 = vld [vmem:[%s1439_s1 + $0x298] sm:$0xff] }
  0x3f   :  { %851 = vmatpush3.msra.mxu0 %v377_v45  ;;  %884 = vmatpush3.msra.mxu1 %v410_v46  ;;  %v179_v15 = vrot.slane %v178_v4, 2  ;;  %v250_v31 = vcombine.low %v161_v12, %v168_v13  ;;  %v369_v44 = vld [vmem:[%s1439_s1 + $0x228] sm:$0xff]  ;;  %v402_v45 = vld [vmem:[%s1439_s1 + $0x330] sm:$0xff]  ;;  %v416_v54 = vld [vmem:[%s1439_s1 + $0x3a0] sm:$0xff] }
  0x40   :  { %852 = vmatprep.subr.mxu0 %v392_v49  ;;  %885 = vmatprep.subr.mxu1 %v425_v50  ;;  %v174_v14 = vrot.slane %v173_v0, 1  ;;  %v224_v36 = vrot.slane %v216_v23, %v1192_v25  ;;  %v231_v39 = vrot.slane %v217_v30, %v1192_v25  ;;  %v368_v49 = vld [vmem:[%s1439_s1 + $0x220] sm:$0xff]  ;;  %v401_v50 = vld [vmem:[%s1439_s1 + $0x328] sm:$0xff]  ;;  %v382_v60 = vld [vmem:[%s1439_s1 + $0x290] sm:$0xff] }
  0x41   :  { %853 = vmatpush3.msra.mxu0 %v376_v55  ;;  %886 = vmatpush3.msra.mxu1 %v409_v56  ;;  %v180_v20 = vadd.f32 %v179_v15, %v178_v4  ;;  %v258_v41 = vrot.slane %v250_v31, %v1192_v25  ;;  %v367_v55 = vld [vmem:[%s1439_s1 + $0x218] sm:$0xff]  ;;  %v400_v56 = vld [vmem:[%s1439_s1 + $0x320] sm:$0xff]  ;;  %v365_v4 = vld [vmem:[%s1439_s1 + $0x208] sm:$0xff] }
  0x42   :  { %854 = vmatprep.subr.mxu0 %v391_v62  ;;  %887 = vmatprep.subr.mxu1 %v424_v63  ;;  %v175_v28 = vadd.f32 %v174_v14, %v173_v0  ;;  %v232_v51 = vcombine.low %v224_v36, %v231_v39  ;;  %v415_v61 = vld [vmem:[%s1439_s1 + $0x398] sm:$0xff]  ;;  %v366_v62 = vld [vmem:[%s1439_s1 + $0x210] sm:$0xff]  ;;  %v380_v7 = vld [vmem:[%s1439_s1 + $0x280] sm:$0xff] }
  0x43   :  { %855 = vmatpush3.msra.mxu0 %v375_v1  ;;  %888 = vmatpush3.msra.mxu1 %v408_v2  ;;  %v181_v29 = vrot.slane %v180_v20, 1  ;;  %v399_v63 = vld [vmem:[%s1439_s1 + $0x318] sm:$0xff]  ;;  %v381_v1 = vld [vmem:[%s1439_s1 + $0x288] sm:$0xff]  ;;  %v414_v2 = vld [vmem:[%s1439_s1 + $0x390] sm:$0xff] }
  0x44   :  { %856 = vmatprep.subr.mxu0 %v390_v5  ;;  %889 = vmatprep.subr.mxu1 %v423_v6  ;;  %v398_v5 = vld [vmem:[%s1439_s1 + $0x310] sm:$0xff]  ;;  %v413_v8 = vld [vmem:[%s1439_s1 + $0x388] sm:$0xff]  ;;  %v412_v13 = vld [vmem:[%s1439_s1 + $0x380] sm:$0xff] }
  0x45   :  { %857 = vmatpush3.msra.mxu0 %v374_v10  ;;  %890 = vmatpush3.msra.mxu1 %v407_v11  ;;  %v182_v57 = vadd.f32 %v181_v29, %v180_v20  ;;  %v364_v10 = vld [vmem:[%s1439_s1 + $0x200] sm:$0xff]  ;;  %v397_v12 = vld [vmem:[%s1439_s1 + $0x308] sm:$0xff] }
  0x46   :  { %858 = vmatprep.subr.mxu0 %v389_v16  ;;  %891 = vmatprep.subr.mxu1 %v422_v17  ;;  %v396_v15 = vld [vmem:[%s1439_s1 + $0x300] sm:$0xff]  ;;  %s941_s1 = smov [#allocation3]  }
  0x47   :  { %859 = vmatpush3.msra.mxu0 %v373_v18  ;;  %892 = vmatpush3.msra.mxu1 %v406_v19  ;;  %v251_v40 = vcombine.low %v175_v28, %v182_v57  ;;  %s767_s27 = sshll.u32 %s941_s1, 4  ;;  %s768_s27 = int_to_ptr.vmem [resolvable:$true] %s767_s27 }
  0x48   :  { %860 = vmatprep.subr.mxu0 %v388_v21  ;;  %893 = vmatprep.subr.mxu1 %v421_v22  ;;  %s918_s28 = scalar_lea.vmem %s768_s27, 32  ;;  %p923_p1 = scmp.lt.s32.totalorder %s768_s27, %s768_s27 }
  0x49   :  { %861 = vmatpush3.msra.mxu0 %v372_v24  ;;  %894 = vmatpush3.msra.mxu1 %v405_v27  ;;  %v265_v46 = vrot.slane %v251_v40, %v1192_v25  ;;  %v775_v24 = vld [vmem:[%s1440_s2] ss:$0 sm:$0xff]  ;;  %p919_p0 = scmp.ne.s32.totalorder %s768_s27, %s918_s28  ;;  %p924_p2 = scmp.lt.s32.totalorder %s918_s28, %s918_s28 }
  0x4a   :  { %862 = vmatprep.subr.mxu0 %v387_v32  ;;  %895 = vmatprep.subr.mxu1 %v420_v33 }
  0x4b   :  { %863 = vmatpush3.msra.mxu0 %v371_v34  ;;  %896 = vmatpush3.msra.mxu1 %v404_v35  ;;  %v266_v52 = vcombine.low %v258_v41, %v265_v46  ;;  %p925_p3 = por %p924_p2, %p923_p1 }
  0x4c   :  { %864 = vmatprep.subr.mxu0 %v386_v58  ;;  %897 = vmatprep.subr.mxu1 %v419_v26 }
  0x4d   :  { %865 = vmatpush3.msra.mxu0 %v370_v37  ;;  %898 = vmatpush3.msra.mxu1 %v403_v38  ;;  %v282_v59 = vrot.slane %v266_v52, 7  ;;  %p926_p4 = pnand %p925_p3, %p919_p0 }
  0x4e   :  { %866 = vmatprep.subr.mxu0 %v385_v42  ;;  %899 = vmatprep.subr.mxu1 %v418_v43 }
  0x4f   :  { %867 = vmatpush3.msra.mxu0 %v369_v44  ;;  %900 = vmatpush3.msra.mxu1 %v402_v45  ;;  %v283_v0 = vsel %vm272_vm0, %v282_v59, %v232_v51 }
  0x50   :  { %868 = vmatprep.subr.mxu0 %v384_v47  ;;  %901 = vmatprep.subr.mxu1 %v417_v48  ;;  %v284_v3 = vsel %vm274_vm1, %v282_v59, %v283_v0 }
  0x51   :  { %869 = vmatpush3.msra.mxu0 %v368_v49  ;;  %902 = vmatpush3.msra.mxu1 %v401_v50  ;;  %v285_v6 = vsel %vm276_vm2, %v282_v59, %v284_v3 }
  0x52   :  { %870 = vmatprep.subr.mxu0 %v383_v53  ;;  %903 = vmatprep.subr.mxu1 %v416_v54  ;;  %v286_v9 = vsel %vm278_vm3, %v282_v59, %v285_v6 }
  0x53   :  { %871 = vmatpush3.msra.mxu0 %v367_v55  ;;  %904 = vmatpush3.msra.mxu1 %v400_v56  ;;  %v299_v11 = vmul.f32 0.0625, %v286_v9 }
  0x54   :  { %872 = vmatprep.subr.mxu0 %v382_v60  ;;  %905 = vmatprep.subr.mxu1 %v415_v61 }
  0x55   :  { %873 = vmatpush3.msra.mxu0 %v366_v62  ;;  %906 = vmatpush3.msra.mxu1 %v399_v63  ;;  %v461_v14 = vrot.slane %v299_v11, %v1192_v25  ;;  %v454_v16 = vcombine.high %v299_v11, %v299_v11 }
  0x56   :  { %874 = vmatprep.subr.mxu0 %v381_v1  ;;  %907 = vmatprep.subr.mxu1 %v414_v2 }
  0x57   :  { %875 = vmatpush3.msra.mxu0 %v365_v4  ;;  %908 = vmatpush3.msra.mxu1 %v398_v5  ;;  %v469_v17 = vcombine.high %v461_v14, %v461_v14  ;;  %v468_v18 = vrot.slane %v454_v16, %v1192_v25 }
  0x58   :  { %876 = vmatprep.subr.mxu0 %v380_v7  ;;  %909 = vmatprep.subr.mxu1 %v413_v8 }
  0x59   :  { %877 = vmatpush3.msra.mxu0 %v364_v10  ;;  %910 = vmatpush3.msra.mxu1 %v397_v12  ;;  %v470_v19 = vcombine.high %v468_v18, %v468_v18 }
  0x5a   :  { %911 = vmatprep.subr.mxu1 %v412_v13  ;;  %683 = vmatprep.mubr.f32.mxu0 %v469_v17 }
  0x5b   :  { %912 = vmatpush3.msra.mxu1 %v396_v15  ;;  %684 = vmatmul.mubr.f32.vlgmr.msra.gmra.mxu0 %v461_v14 }
  0x5c   :  { %753 = vmatprep.mubr.f32.mxu1 %v470_v19 }
  0x5d   :  { %754 = vmatmul.mubr.f32.vlgmr.msra.gmra.mxu1 %v468_v18 }
  0xfa   :  { %v808_v20 = vpop.f32.mrf.mxu0 }
  0xfc   :  { %v809_v21 = vpop.f32.mrf.mxu0  ;;  %v843_v22 = vpop.f32.mrf.mxu1 }
  0xfd   :  { %v810_v23 = vadd.f32 %v809_v21, %v808_v20 }
  0xfe   :  { %v844_v27 = vpop.f32.mrf.mxu1 }
  0xff   :  { %v546_v28 = vadd.f32 %v810_v23, %v775_v24  ;;  %v845_v29 = vadd.f32 %v844_v27, %v843_v22 }
 0x101   :  { %v616_v32 = vadd.f32 %v845_v29, %v546_v28 }
 0x11b   :  { %v878_v30 = vpop.f32.mrf.mxu0 }
 0x11d   :  { %v879_v31 = vpop.f32.mrf.mxu0  ;;  %v913_v25 = vpop.f32.mrf.mxu1 }
 0x11e   :  { %v880_v33 = vadd.f32 %v879_v31, %v878_v30 }
 0x11f   :  { %v914_v34 = vpop.f32.mrf.mxu1 }
 0x120   :  { %v686_v35 = vadd.f32 %v880_v33, %v616_v32  ;;  %v915_v57 = vadd.f32 %v914_v34, %v913_v25 }
 0x122   :  { %v756_v58 = vadd.f32 %v915_v57, %v686_v35 }
 0x124   :  { %760 = vst.msk [vmem:[#allocation3] sm:$0x3] %vm759_vm4, %v756_v58 }
 0x125   :  { %929 = shalt.err (!%p926_p4)
}
 0x126   :  { %770 = dma.vmem_to_hbm [thread:$0]  %s768_s27, 32, %s1441_s3, [#allocation4]  }
 0x127   :  { %938 = dma.done.wait [#allocation4], 32  }
 0x128   :  { %939 = vsyncadd [#allocation4], 4294967264 }
 0x129   :  { %774 = vsyncpa [#allocation4], 1 }

</bundles_post_ra>
